<compile_context>
chip_gen: v7x
topology: tpu7x:2x2x1
jax: 0.10.0
libtpu: 0.0.40
codegen_flags: <defaults>
</compile_context>

<pallas_src>
import math
import functools

import jax
import jax.numpy as jnp
from jax.experimental import pallas as pl
from jax.experimental.pallas import tpu as pltpu


# ----------------------------------------------------------------------------
# Kernel
# ----------------------------------------------------------------------------
def _mha_kernel(xq_ref, xkv_ref,
                wq_ref, bq_ref, wkv_ref, bkv_ref, wo_ref, bo_ref,
                out_ref, *, n_heads: int, n_q: int, n_kv: int, b_block: int):
    d = wq_ref.shape[0]
    d_head = d // n_heads
    cdt = wq_ref.dtype              # bf16 compute dtype for MXU operands

    # Fused projections on pre-transposed (in, out) weights — no in-kernel .T.
    # W_q / b_q already carry the 1/sqrt(d_head) scale (folded at pack time).
    q = jnp.dot(xq_ref[...].astype(cdt), wq_ref[...],
                preferred_element_type=jnp.float32) + bq_ref[...]
    kv = jnp.dot(xkv_ref[...].astype(cdt), wkv_ref[...],
                 preferred_element_type=jnp.float32) + bkv_ref[...]
    k = kv[:, :d]
    v = kv[:, d:]

    def split_heads(t, t_len):
        # (b*T, h*d_head) -> (b*h, T, d_head).  Lane->sublane relayout is
        # inherent when d_head < 128; do it on bf16 data (half the bytes).
        t = t.reshape(b_block, t_len, n_heads, d_head)
        t = jnp.swapaxes(t, 1, 2)
        return t.reshape(b_block * n_heads, t_len, d_head)

    qh = split_heads(q.astype(cdt), n_q)
    kh = split_heads(k.astype(cdt), n_kv)
    vh = split_heads(v.astype(cdt), n_kv)

    # Head-batched attention on the MXU (leading batch dim -> supported form);
    # softmax math stays in f32 on the VPU/EUP.
    # TODO(synk): at real ft-transformer widths with n_kv < 128, pad the kv
    # token axis to 128 in the wrapper and mask padded scores to -inf here.
    s = jnp.einsum('bqd,bkd->bqk', qh, kh, preferred_element_type=jnp.float32)
    s = s - jnp.max(s, axis=-1, keepdims=True)
    p = jnp.exp(s)
    p = p * pl.reciprocal(jnp.sum(p, axis=-1, keepdims=True), approx=True)
    o = jnp.einsum('bqk,bkd->bqd', p.astype(cdt), vh,
                   preferred_element_type=jnp.float32)

    # Merge heads back to a lane-flattened (b*n_q, d) slab (cast first, then
    # relayout) and run the output projection.
    o = o.astype(cdt).reshape(b_block, n_heads, n_q, d_head)
    o = jnp.swapaxes(o, 1, 2).reshape(b_block * n_q, d)
    y = jnp.dot(o, wo_ref[...], preferred_element_type=jnp.float32) + bo_ref[...]
    out_ref[...] = y.astype(out_ref.dtype)


# ----------------------------------------------------------------------------
# Wrapper helpers
# ----------------------------------------------------------------------------
def pack_params(params, n_heads, compute_dtype=jnp.bfloat16):
    """One-time parameter packing (hoisted out of the forward call path).

    params = (wq, bq, wk, bk, wv, bv, wo, bo) in PyTorch (out, in) convention,
    biases shaped (1, d).  Returns pre-transposed (in, out) bf16 weights with
    the K/V projections fused and 1/sqrt(d_head) folded into W_q / b_q.
    """
    wq, bq, wk, bk, wv, bv, wo, bo = params
    d = wq.shape[0]
    assert d % n_heads == 0
    scale = 1.0 / math.sqrt(d // n_heads)
    wq_t = (wq.T * scale).astype(compute_dtype)                    # (d, d)
    bq_s = (bq * scale).astype(jnp.float32)                        # (1, d)
    wkv_t = jnp.concatenate([wk.T, wv.T], axis=1).astype(compute_dtype)  # (d, 2d)
    bkv = jnp.concatenate([bk, bv], axis=1).astype(jnp.float32)    # (1, 2d)
    wo_t = wo.T.astype(compute_dtype)                              # (d, d)
    return (wq_t, bq_s, wkv_t, bkv, wo_t, bo.astype(jnp.float32))


def _choose_b_block(B, n_q, n_kv, target_rows=512):
    """Pick a batch tile: ~target_rows query rows per grid step, nb >= 2
    (pipelining + megacore), sublane-aligned blocks.  Falls back to the whole
    batch when no divisor satisfies the (., 8) alignment."""
    candidates = [b for b in range(1, B) if B % b == 0
                  and (b * n_q) % 8 == 0 and (b * n_kv) % 8 == 0]
    if not candidates:
        return B
    def rank(b):
        nb = B // b
        return (nb % 2 != 0, abs(b * n_q - target_rows))
    return min(candidates, key=rank)


def _pick_vmem_limit():
    """Per-generation scoped VMEM limit: capacity//2, clamped to [32, 100] MiB
    (v5e/v6e: 64 MiB of 128; v7x: 32 MiB of 64)."""
    try:
        cap = int(pltpu.get_tpu_info().vmem_capacity_bytes)
        return int(max(32 * 1024 * 1024, min(cap // 2, 100 * 1024 * 1024)))
    except Exception:
        return 64 * 1024 * 1024


@functools.lru_cache(maxsize=1)
def _weight_buffering_supported():
    """Probe whether pipeline_mode=pl.Buffered(1) on a grid-invariant input is
    accepted by this JAX/Mosaic version (compiled + executed once, tiny)."""
    try:
        def _k(x_ref, o_ref):
            o_ref[...] = x_ref[...] + 1.0
        fn = pl.pallas_call(
            _k,
            out_shape=jax.ShapeDtypeStruct((16, 128), jnp.float32),
            grid=(2,),
            in_specs=[pl.BlockSpec((8, 128), lambda i: (0, 0),
                                   pipeline_mode=pl.Buffered(1))],
            out_specs=pl.BlockSpec((8, 128), lambda i: (i, 0)),
        )
        jax.block_until_ready(fn(jnp.zeros((8, 128), jnp.float32)))
        return True
    except Exception:
        return False


# ----------------------------------------------------------------------------
# Forward pass
# ----------------------------------------------------------------------------
def multihead_attention(x_q, x_kv, packed_params, n_heads, *, b_block=None,
                        out_dtype=jnp.float32):
    """MultiheadAttention forward (compression=None, dropout=0).

    `packed_params` must come from pack_params() (computed once, cached by the
    caller).  Set out_dtype=jnp.bfloat16 if the consumer accepts bf16 to halve
    output HBM writeback bytes.
    """
    B, n_q, d = x_q.shape
    Bk, n_kv, dk = x_kv.shape
    assert Bk == B and dk == d and d % n_heads == 0
    wq_t, bq, wkv_t, bkv, wo_t, bo = packed_params
    d_head = d // n_heads

    if b_block is None:
        b_block = _choose_b_block(B, n_q, n_kv)
    assert B % b_block == 0
    nb = B // b_block
    if nb > 1:
        # (8, 128) sublane constraint on the tiled 2-D activation slabs.
        assert (b_block * n_q) % 8 == 0 and (b_block * n_kv) % 8 == 0, (
            "b_block*n_q and b_block*n_kv must be multiples of 8 when tiling")

    # Lane-flattened activation slabs (tokens on sublanes, features on lanes).
    xq2 = x_q.reshape(B * n_q, d).astype(jnp.float32)
    xkv2 = x_kv.reshape(B * n_kv, d).astype(jnp.float32)

    kernel = functools.partial(_mha_kernel, n_heads=n_heads,
                               n_q=n_q, n_kv=n_kv, b_block=b_block)

    flops = 2 * B * (n_q * d * d                       # Q projection
                     + n_kv * d * 2 * d                # fused K/V projection
                     + 2 * n_heads * n_q * n_kv * d_head   # scores + PV
                     + n_q * d * d)                    # output projection
    bytes_accessed = (4 * (xq2.size + xkv2.size + bq.size + bkv.size + bo.size
                           + B * n_q * d)
                      + 2 * (wq_t.size + wkv_t.size + wo_t.size))
    cost = pl.CostEstimate(flops=flops,
                           transcendentals=B * n_heads * n_q * n_kv,
                           bytes_accessed=bytes_accessed)

    use_buffered = _weight_buffering_supported()
    wkw = ({"pipeline_mode": pl.Buffered(1)} if use_buffered else {})

    out2 = pl.pallas_call(
        kernel,
        out_shape=jax.ShapeDtypeStruct((B * n_q, d), out_dtype),
        grid_spec=pltpu.PrefetchScalarGridSpec(
            num_scalar_prefetch=0,
            grid=(nb,),
            in_specs=[
                pl.BlockSpec((b_block * n_q, d), lambda i: (i, 0)),
                pl.BlockSpec((b_block * n_kv, d), lambda i: (i, 0)),
                pl.BlockSpec((d, d), lambda i: (0, 0), **wkw),        # W_q^T (scaled)
                pl.BlockSpec((1, d), lambda i: (0, 0), **wkw),        # b_q   (scaled)
                pl.BlockSpec((d, 2 * d), lambda i: (0, 0), **wkw),    # [W_k^T | W_v^T]
                pl.BlockSpec((1, 2 * d), lambda i: (0, 0), **wkw),    # [b_k | b_v]
                pl.BlockSpec((d, d), lambda i: (0, 0), **wkw),        # W_out^T
                pl.BlockSpec((1, d), lambda i: (0, 0), **wkw),        # b_out
            ],
            out_specs=pl.BlockSpec((b_block * n_q, d), lambda i: (i, 0)),
        ),
        compiler_params=pltpu.CompilerParams(
            dimension_semantics=("parallel",),
            vmem_limit_bytes=_pick_vmem_limit()),
        cost_estimate=cost,
    )(xq2, xkv2, wq_t, bq, wkv_t, bkv, wo_t, bo)

    return out2.reshape(B, n_q, d)


# ----------------------------------------------------------------------------
# Reference / init / self-test
# ----------------------------------------------------------------------------
def _xavier_uniform(key, shape, gain):
    fan_out, fan_in = shape
    a = gain * math.sqrt(6.0 / (fan_in + fan_out))
    return jax.random.uniform(key, shape, jnp.float32, -a, a)


def _default_linear_weight(key, shape):
    # PyTorch default nn.Linear init: U(-1/sqrt(fan_in), 1/sqrt(fan_in))
    fan_in = shape[1]
    a = 1.0 / math.sqrt(fan_in)
    return jax.random.uniform(key, shape, jnp.float32, -a, a)


def _reference(x_q, x_kv, params, n_heads):
    # Pure-JAX f32 reimplementation of the PyTorch forward
    # (no compression, no dropout).
    wq, bq, wk, bk, wv, bv, wo, bo = params
    B, n_q, d = x_q.shape
    d_head = d // n_heads

    def reshape(t):
        Bq, T, D = t.shape
        return (t.reshape(Bq, T, n_heads, D // n_heads)
                 .transpose(0, 2, 1, 3)
                 .reshape(Bq * n_heads, T, D // n_heads))

    q = x_q @ wq.T + bq[0]
    k = x_kv @ wk.T + bk[0]
    v = x_kv @ wv.T + bv[0]
    qh, kh, vh = reshape(q), reshape(k), reshape(v)
    att = jax.nn.softmax(qh @ jnp.swapaxes(kh, 1, 2) / math.sqrt(d_head), axis=-1)
    x = att @ vh
    x = (x.reshape(B, n_heads, n_q, d_head)
          .transpose(0, 2, 1, 3)
          .reshape(B, n_q, d))
    return x @ wo.T + bo[0]


if __name__ == "__main__":
    B, n_q, n_kv, d, n_heads = 2, 8, 8, 32, 4

    key = jax.random.PRNGKey(0)
    k_xq, k_xkv, k_wq, k_wk, k_wv, k_wo = jax.random.split(key, 6)

    x_q = jax.random.normal(k_xq, (B, n_q, d), jnp.float32)
    x_kv = jax.random.normal(k_xkv, (B, n_kv, d), jnp.float32)

    gain = 1.0 / math.sqrt(2.0)  # 'xavier' initialization, n_heads > 1
    wq = _xavier_uniform(k_wq, (d, d), gain)
    wk = _xavier_uniform(k_wk, (d, d), gain)
    wv = _xavier_uniform(k_wv, (d, d), gain)
    wo = _default_linear_weight(k_wo, (d, d))
    bq = jnp.zeros((1, d), jnp.float32)
    bk = jnp.zeros((1, d), jnp.float32)
    bv = jnp.zeros((1, d), jnp.float32)
    bo = jnp.zeros((1, d), jnp.float32)

    params = (wq, bq, wk, bk, wv, bv, wo, bo)

    # Pack once (hoisted out of the forward call path), then run the kernel.
    packed = jax.block_until_ready(pack_params(params, n_heads))
    out = multihead_attention(x_q, x_kv, packed, n_heads)
    out = jax.block_until_ready(out)

    ref = _reference(x_q, x_kv, params, n_heads)
    assert out.shape == (B, n_q, d)
    # Tolerance relaxed for bf16 MXU operands + approx reciprocal (f32 ref).
    assert jnp.allclose(out, ref, atol=5e-2, rtol=5e-2), "mismatch vs JAX reference"

    print("KERNEL_OK")
</pallas_src>

<mosaic_0001>
module attributes {stable_mosaic.version = 11 : i64} {
  func.func @_k(%arg0: i32, %arg1: memref<8x128xf32, #tpu.memory_space<vmem>>, %arg2: memref<8x128xf32, #tpu.memory_space<vmem>>) attributes {dimension_semantics = [#tpu.dimension_semantics<arbitrary>], iteration_bounds = array<i64: 2>, scalar_prefetch = 0 : i64, scratch_operands = 0 : i64, tpu.core_type = #tpu.core_type<tc>, window_params = [{pipeline_mode = #tpu.pipeline_mode<synchronous>, transform_indices = @transform_0, window_bounds = array<i64: 8, 128>}, {transform_indices = @transform_1, window_bounds = array<i64: 8, 128>}]} {
    %c0 = arith.constant 0 : index
    %c0_0 = arith.constant 0 : index
    %0 = vector.load %arg1[%c0, %c0_0] : memref<8x128xf32, #tpu.memory_space<vmem>>, vector<8x128xf32>
    %cst = arith.constant 1.000000e+00 : f32
    %1 = vector.broadcast %cst : f32 to vector<8x128xf32>
    %2 = arith.addf %0, %1 : vector<8x128xf32>
    %c0_1 = arith.constant 0 : index
    %c0_2 = arith.constant 0 : index
    %3 = vector.load %arg2[%c0_1, %c0_2] : memref<8x128xf32, #tpu.memory_space<vmem>>, vector<8x128xf32>
    tpu.vector_store %arg2[%c0_1, %c0_2], %2 {strides = array<i32>} : memref<8x128xf32, #tpu.memory_space<vmem>>, vector<8x128xf32>,
    return
  }
  func.func @transform_0(%arg0: i32) -> (i32, i32) {
    %c0_i32 = arith.constant 0 : i32
    %c0_i32_0 = arith.constant 0 : i32
    %c0_i32_1 = arith.constant 0 : i32
    return %c0_i32, %c0_i32_0 : i32, i32
  }
  func.func @transform_1(%arg0: i32) -> (i32, i32) {
    %c0_i32 = arith.constant 0 : i32
    %c0_i32_0 = arith.constant 0 : i32
    return %arg0, %c0_i32 : i32, i32
  }
}

module attributes {stable_mosaic.version = 11 : i64} {
  func.func @_mha_kernel(%arg0: i32, %arg1: memref<8x32xf32, #tpu.memory_space<vmem>>, %arg2: memref<8x32xf32, #tpu.memory_space<vmem>>, %arg3: memref<32x32xbf16, #tpu.memory_space<vmem>>, %arg4: memref<1x32xf32, #tpu.memory_space<vmem>>, %arg5: memref<32x64xbf16, #tpu.memory_space<vmem>>, %arg6: memref<1x64xf32, #tpu.memory_space<vmem>>, %arg7: memref<32x32xbf16, #tpu.memory_space<vmem>>, %arg8: memref<1x32xf32, #tpu.memory_space<vmem>>, %arg9: memref<8x32xf32, #tpu.memory_space<vmem>>) attributes {dimension_semantics = [#tpu.dimension_semantics<parallel>], iteration_bounds = array<i64: 2>, scalar_prefetch = 0 : i64, scratch_operands = 0 : i64, tpu.core_type = #tpu.core_type<tc>, window_params = [{transform_indices = @transform_0, window_bounds = array<i64: 8, 32>}, {transform_indices = @transform_1, window_bounds = array<i64: 8, 32>}, {pipeline_mode = #tpu.pipeline_mode<synchronous>, transform_indices = @transform_2, window_bounds = array<i64: 32, 32>}, {pipeline_mode = #tpu.pipeline_mode<synchronous>, transform_indices = @transform_3, window_bounds = array<i64: 1, 32>}, {pipeline_mode = #tpu.pipeline_mode<synchronous>, transform_indices = @transform_4, window_bounds = array<i64: 32, 64>}, {pipeline_mode = #tpu.pipeline_mode<synchronous>, transform_indices = @transform_5, window_bounds = array<i64: 1, 64>}, {pipeline_mode = #tpu.pipeline_mode<synchronous>, transform_indices = @transform_6, window_bounds = array<i64: 32, 32>}, {pipeline_mode = #tpu.pipeline_mode<synchronous>, transform_indices = @transform_7, window_bounds = array<i64: 1, 32>}, {transform_indices = @transform_8, window_bounds = array<i64: 8, 32>}]} {
    %c0 = arith.constant 0 : index
    %c0_0 = arith.constant 0 : index
    %0 = vector.load %arg1[%c0, %c0_0] : memref<8x32xf32, #tpu.memory_space<vmem>>, vector<8x32xf32>
    %1 = arith.truncf %0 : vector<8x32xf32> to vector<8x32xbf16>
    %c0_1 = arith.constant 0 : index
    %c0_2 = arith.constant 0 : index
    %2 = vector.load %arg3[%c0_1, %c0_2] : memref<32x32xbf16, #tpu.memory_space<vmem>>, vector<32x32xbf16>
    %cst = arith.constant dense<0.000000e+00> : vector<8x32xf32>
    %3 = tpu.matmul %1, %2, %cst {dimension_numbers = #tpu.dot_dimension_numbers<[1], [0], [0], [1], [0, 0, 1, 1], [], []>} : vector<8x32xbf16>, vector<32x32xbf16>, vector<8x32xf32> -> vector<8x32xf32>
    %c0_3 = arith.constant 0 : index
    %c0_4 = arith.constant 0 : index
    %4 = vector.load %arg4[%c0_3, %c0_4] : memref<1x32xf32, #tpu.memory_space<vmem>>, vector<1x32xf32>
    %5 = vector.broadcast %4 : vector<1x32xf32> to vector<8x32xf32>
    %6 = arith.addf %3, %5 : vector<8x32xf32>
    %c0_5 = arith.constant 0 : index
    %c0_6 = arith.constant 0 : index
    %7 = vector.load %arg2[%c0_5, %c0_6] : memref<8x32xf32, #tpu.memory_space<vmem>>, vector<8x32xf32>
    %8 = arith.truncf %7 : vector<8x32xf32> to vector<8x32xbf16>
    %c0_7 = arith.constant 0 : index
    %c0_8 = arith.constant 0 : index
    %9 = vector.load %arg5[%c0_7, %c0_8] : memref<32x64xbf16, #tpu.memory_space<vmem>>, vector<32x64xbf16>
    %cst_9 = arith.constant dense<0.000000e+00> : vector<8x64xf32>
    %10 = tpu.matmul %8, %9, %cst_9 {dimension_numbers = #tpu.dot_dimension_numbers<[1], [0], [0], [1], [0, 0, 1, 1], [], []>} : vector<8x32xbf16>, vector<32x64xbf16>, vector<8x64xf32> -> vector<8x64xf32>
    %c0_10 = arith.constant 0 : index
    %c0_11 = arith.constant 0 : index
    %11 = vector.load %arg6[%c0_10, %c0_11] : memref<1x64xf32, #tpu.memory_space<vmem>>, vector<1x64xf32>
    %12 = vector.broadcast %11 : vector<1x64xf32> to vector<8x64xf32>
    %13 = arith.addf %10, %12 : vector<8x64xf32>
    %14 = vector.extract_strided_slice %13 {offsets = [0, 0], sizes = [8, 32], strides = [1, 1]} : vector<8x64xf32> to vector<8x32xf32>
    %15 = vector.extract_strided_slice %13 {offsets = [0, 32], sizes = [8, 32], strides = [1, 1]} : vector<8x64xf32> to vector<8x32xf32>
    %16 = arith.truncf %6 : vector<8x32xf32> to vector<8x32xbf16>
    %17 = vector.shape_cast %16 : vector<8x32xbf16> to vector<1x8x4x8xbf16>
    %18 = tpu.transpose %17, [0, 2, 1, 3] : vector<1x8x4x8xbf16> -> vector<1x4x8x8xbf16>
    %19 = vector.shape_cast %18 : vector<1x4x8x8xbf16> to vector<4x8x8xbf16>
    %20 = arith.truncf %14 : vector<8x32xf32> to vector<8x32xbf16>
    %21 = vector.shape_cast %20 : vector<8x32xbf16> to vector<1x8x4x8xbf16>
    %22 = tpu.transpose %21, [0, 2, 1, 3] : vector<1x8x4x8xbf16> -> vector<1x4x8x8xbf16>
    %23 = vector.shape_cast %22 : vector<1x4x8x8xbf16> to vector<4x8x8xbf16>
    %24 = arith.truncf %15 : vector<8x32xf32> to vector<8x32xbf16>
    %25 = vector.shape_cast %24 : vector<8x32xbf16> to vector<1x8x4x8xbf16>
    %26 = tpu.transpose %25, [0, 2, 1, 3] : vector<1x8x4x8xbf16> -> vector<1x4x8x8xbf16>
    %27 = vector.shape_cast %26 : vector<1x4x8x8xbf16> to vector<4x8x8xbf16>
    "tpu.trace_start"() <{level = 10 : i32, message = "bqd,bkd->bqk"}> : () -> ()
    %cst_12 = arith.constant dense<0.000000e+00> : vector<4x8x8xf32>
    %28 = tpu.matmul %19, %23, %cst_12 {dimension_numbers = #tpu.dot_dimension_numbers<[2], [2], [1], [1], [0, 0, 0, 1, 1, 1], [0], [0]>} : vector<4x8x8xbf16>, vector<4x8x8xbf16>, vector<4x8x8xf32> -> vector<4x8x8xf32>
    "tpu.trace_stop"() : () -> ()
    %cst_13 = arith.constant dense<0xFF800000> : vector<4x8xf32>
    %29 = vector.multi_reduction <maximumf>, %28, %cst_13 [2] : vector<4x8x8xf32> to vector<4x8xf32>
    %30 = vector.shape_cast %29 : vector<4x8xf32> to vector<4x8x1xf32>
    %31 = vector.broadcast %30 : vector<4x8x1xf32> to vector<4x8x8xf32>
    %32 = arith.subf %28, %31 : vector<4x8x8xf32>
    %33 = math.exp %32 : vector<4x8x8xf32>
    %cst_14 = arith.constant dense<0.000000e+00> : vector<4x8xf32>
    %34 = vector.multi_reduction <add>, %33, %cst_14 [2] : vector<4x8x8xf32> to vector<4x8xf32>
    %35 = vector.shape_cast %34 : vector<4x8xf32> to vector<4x8x1xf32>
    %36 = tpu.reciprocal %35 {approx = true} : vector<4x8x1xf32> -> vector<4x8x1xf32>
    %37 = vector.broadcast %36 : vector<4x8x1xf32> to vector<4x8x8xf32>
    %38 = arith.mulf %33, %37 : vector<4x8x8xf32>
    %39 = arith.truncf %38 : vector<4x8x8xf32> to vector<4x8x8xbf16>
    "tpu.trace_start"() <{level = 10 : i32, message = "bqk,bkd->bqd"}> : () -> ()
    %cst_15 = arith.constant dense<0.000000e+00> : vector<4x8x8xf32>
    %40 = tpu.matmul %39, %27, %cst_15 {dimension_numbers = #tpu.dot_dimension_numbers<[2], [1], [1], [2], [0, 0, 0, 1, 1, 2], [0], [0]>} : vector<4x8x8xbf16>, vector<4x8x8xbf16>, vector<4x8x8xf32> -> vector<4x8x8xf32>
    "tpu.trace_stop"() : () -> ()
    %41 = arith.truncf %40 : vector<4x8x8xf32> to vector<4x8x8xbf16>
    %42 = vector.shape_cast %41 : vector<4x8x8xbf16> to vector<1x4x8x8xbf16>
    %43 = tpu.transpose %42, [0, 2, 1, 3] : vector<1x4x8x8xbf16> -> vector<1x8x4x8xbf16>
    %44 = vector.shape_cast %43 : vector<1x8x4x8xbf16> to vector<8x32xbf16>
    %c0_16 = arith.constant 0 : index
    %c0_17 = arith.constant 0 : index
    %45 = vector.load %arg7[%c0_16, %c0_17] : memref<32x32xbf16, #tpu.memory_space<vmem>>, vector<32x32xbf16>
    %cst_18 = arith.constant dense<0.000000e+00> : vector<8x32xf32>
    %46 = tpu.matmul %44, %45, %cst_18 {dimension_numbers = #tpu.dot_dimension_numbers<[1], [0], [0], [1], [0, 0, 1, 1], [], []>} : vector<8x32xbf16>, vector<32x32xbf16>, vector<8x32xf32> -> vector<8x32xf32>
    %c0_19 = arith.constant 0 : index
    %c0_20 = arith.constant 0 : index
    %47 = vector.load %arg8[%c0_19, %c0_20] : memref<1x32xf32, #tpu.memory_space<vmem>>, vector<1x32xf32>
    %48 = vector.broadcast %47 : vector<1x32xf32> to vector<8x32xf32>
    %49 = arith.addf %46, %48 : vector<8x32xf32>
    %c0_21 = arith.constant 0 : index
    %c0_22 = arith.constant 0 : index
    %50 = vector.load %arg9[%c0_21, %c0_22] : memref<8x32xf32, #tpu.memory_space<vmem>>, vector<8x32xf32>
    tpu.vector_store %arg9[%c0_21, %c0_22], %49 {strides = array<i32>} : memref<8x32xf32, #tpu.memory_space<vmem>>, vector<8x32xf32>,
    return
  }
  func.func @transform_0(%arg0: i32) -> (i32, i32) {
    %c0_i32 = arith.constant 0 : i32
    %c0_i32_0 = arith.constant 0 : i32
    return %arg0, %c0_i32 : i32, i32
  }
  func.func @transform_1(%arg0: i32) -> (i32, i32) {
    %c0_i32 = arith.constant 0 : i32
    %c0_i32_0 = arith.constant 0 : i32
    return %arg0, %c0_i32 : i32, i32
  }
  func.func @transform_2(%arg0: i32) -> (i32, i32) {
    %c0_i32 = arith.constant 0 : i32
    %c0_i32_0 = arith.constant 0 : i32
    %c0_i32_1 = arith.constant 0 : i32
    return %c0_i32, %c0_i32_0 : i32, i32
  }
  func.func @transform_3(%arg0: i32) -> (i32, i32) {
    %c0_i32 = arith.constant 0 : i32
    %c0_i32_0 = arith.constant 0 : i32
    %c0_i32_1 = arith.constant 0 : i32
    return %c0_i32, %c0_i32_0 : i32, i32
  }
  func.func @transform_4(%arg0: i32) -> (i32, i32) {
    %c0_i32 = arith.constant 0 : i32
    %c0_i32_0 = arith.constant 0 : i32
    %c0_i32_1 = arith.constant 0 : i32
    return %c0_i32, %c0_i32_0 : i32, i32
  }
  func.func @transform_5(%arg0: i32) -> (i32, i32) {
    %c0_i32 = arith.constant 0 : i32
    %c0_i32_0 = arith.constant 0 : i32
    %c0_i32_1 = arith.constant 0 : i32
    return %c0_i32, %c0_i32_0 : i32, i32
  }
  func.func @transform_6(%arg0: i32) -> (i32, i32) {
    %c0_i32 = arith.constant 0 : i32
    %c0_i32_0 = arith.constant 0 : i32
    %c0_i32_1 = arith.constant 0 : i32
    return %c0_i32, %c0_i32_0 : i32, i32
  }
  func.func @transform_7(%arg0: i32) -> (i32, i32) {
    %c0_i32 = arith.constant 0 : i32
    %c0_i32_0 = arith.constant 0 : i32
    %c0_i32_1 = arith.constant 0 : i32
    return %c0_i32, %c0_i32_0 : i32, i32
  }
  func.func @transform_8(%arg0: i32) -> (i32, i32) {
    %c0_i32 = arith.constant 0 : i32
    %c0_i32_0 = arith.constant 0 : i32
    return %arg0, %c0_i32 : i32, i32
  }
}

</mosaic_0001>

<bundles_post_ra>
// kernel: tpu_custom_call.1
= control target key start
LH: loop header
LB: loop body
LE: loop exit
PB: predicated region body
PF: predicated region fallthrough
CT: control target
= control target key end

     0   :  { %6 = vsyncpa [#allocation3], 0  ;;  %s482_s0 = inlined_call_operand.hbm [shape: f32[8,128], index: 0, kind: input, shape index: {}]   ;;  %s483_s1 = inlined_call_operand.hbm [shape: f32[16,128], index: 1, kind: output, shape index: {}]  }
   0x1   :  { %7 = vsyncpa [#allocation4], 0 }
   0x2   :  { %9 = vsyncpa [#allocation4 + $0x1], 0  ;;  %s352_s6 = smov 0   ;;  %s354_s7 = smov 0  }
   0x3   :  { %s356_s8 = smov 0   ;;  %s358_s9 = smov 0  }
   0x4 LB: > { %s373_s10 = sadd.s32 4294967295, %s338_s9   ;;  %s184_s11 = sadd.s32 4294967294, %s338_s9   ;;  %s338_s9 = sphi %s358_s9, %s499_s9   ;;  %s334_s8 = sphi %s356_s8, %s498_s8   ;;  %s330_s7 = sphi %s354_s7, %s497_s7   ;;  %s326_s6 = sphi %s352_s6, %s496_s6  }
   0x5   : > { %s377_s12 = sadd.s32 1, %s338_s9   ;;  %s43_s13 = sadd.s32 1, %s334_s8 }
   0x6   : > { %s40_s14 = ssub.s32 %s338_s9, %s377_s12  ;;  %p53_p0 = scmp.ne.s32.totalorder %s334_s8, %s330_s7 }
   0x7   : > { %p41_p1 = scmp.eq.s32.totalorder %s40_s14, 0  ;;  %p54_p2 = scmp.eq.s32.totalorder %s373_s10, 1 }
   0x8   : > { %p59_p3 = scmp.ne.s32.totalorder %s330_s7, %s326_s6  ;;  %p60_p4 = scmp.eq.s32.totalorder %s184_s11, 1 }
   0x9   : > { %s388_s15 = scalar_select %p41_p1, %s334_s8, %s43_s13  }
   0xa   : > { %p390_p5 = por %p54_p2, %p53_p0  ;;  %p394_p6 = por %p60_p4, %p59_p3 }
   0xb   : > { %p185_p7 = scmp.ge.s32.totalorder %s338_s9, 1  ;;  %p67_p8 = scmp.lt.s32.totalorder %s338_s9, 3 }
   0xc   : > { %s487_s16 = scalar_select %p390_p5, 1, 0 }
   0xd   : > { %s488_s17 = scalar_select %p394_p6, 1, 0 }
   0xe   : > { %p484_p9 = scmp.eq.s32.totalorder %s373_s10, 0  ;;  %p401_p10 = pnand %p185_p7, %p67_p8 }
   0xf   : > { %s340_s19 = smov [#allocation2]   ;;  %s244_s24 = scalar_lea.hbm %s482_s0, 128 }
  0x10   : > { %s489_s18 = scalar_select %p401_p10, 1, 0 }
  0x11   : > { %s80_s20 = sshll.u32 %s340_s19, 4  ;;  %p200_p11 = pneg %p401_p10  ;;  %s81_s20 = int_to_ptr.vmem [resolvable:$true] %s80_s20 }
  0x12   : > { %p245_p13 = scmp.ne.s32.totalorder %s482_s0, %s244_s24  ;;  %p251_p3 = scmp.lt.u32.totalorder %s244_s24, %s482_s0 }
  0x13   : > { %p409_p12 = pnand %p484_p9, %p200_p11 }
  0x15   : > { %p246_p0 = pneg %p409_p12 }
  0x17   : > { %p247_p1 = pnand %p246_p0, %p245_p13 }
  0x19   : > { %p248_p2 = pneg %p247_p1 }
  0x1b   : > { %p253_p4 = pnand %p251_p3, %p248_p2 }
  0x1d   : > { %256 = shalt.err (!%p253_p4)
}
  0x1e   : > { %s257_s29 = scalar_lea.vmem %s81_s20, 128  ;;  %p265_p9 = scmp.lt.s32.totalorder %s81_s20, %s81_s20 }
  0x1f   : > { %p258_p7 = scmp.ne.s32.totalorder %s81_s20, %s257_s29  ;;  %p266_p6 = scmp.lt.s32.totalorder %s257_s29, %s257_s29 }
  0x21   : > { %p260_p8 = pnand %p258_p7, %p246_p0  ;;  %p267_p5 = por %p266_p6, %p265_p9 }
  0x23   : > { %p261_p11 = pneg %p260_p8 }
  0x25   : > { %p268_p10 = pnand %p267_p5, %p261_p11 }
  0x27   : > { %271 = shalt.err (!%p268_p10)
}
  0x28   : > { %203 = dma.hbm_to_vmem [thread:$0]  (!%p409_p12), %s482_s0, 128, %s81_s20, [#allocation3]  }
  0x29   : > { %p491_p13 = scmp.ne.s32.totalorder %s489_s18, 0 }
  0x2a   : > { %p492_p1 = scmp.eq.s32.totalorder (!%p491_p13), %s373_s10, 0 }
  0x2b   : > { %93 = sbr.rel (%p491_p13) target bundleno = 77 (0x4d), region = 24 }
  0x32   : > { %317 = dma.done.wait (%p492_p1), [#allocation3], 128   ;;  %p493_p0 = pmov %p492_p1 }
  0x33   : > { %s105_s3 = sand.u32 1, %s330_s7   ;;  %s191_s13 = sshll.u32 %s373_s10, 7  ;;  %v108_v0 = vld [vmem:[#allocation2] sm:$0xff] }
  0x34   : > { %319 = vsyncadd (%p493_p0), [#allocation3], 4294967168  ;;  %s189_s4 = sshll.u32 %s105_s3, 3  ;;  %v109_v1 = vadd.f32 1.0, %v108_v0  ;;  %s442_s19 = scalar_lea.hbm %s483_s1, %s191_s13 }
  0x35   : > { %s107_s5 = scalar_lea.vmem [#allocation5], %s189_s4  ;;  %s112_s20 = scalar_lea.sflag [#allocation4], %s105_s3 }
  0x36   : > { %s125_s11 = sshll.u32 %s107_s5, 4  ;;  %110 = vst [vmem:[%s107_s5] sm:$0xff] %v109_v1  ;;  %p494_p6 = scmp.ne.s32.totalorder %s487_s16, 0  ;;  %s437_s11 = int_to_ptr.vmem [resolvable:$true] %s125_s11 }
  0x37   : > { %s272_s21 = scalar_lea.vmem %s437_s11, 128  ;;  %s341_s10 = smov [#allocation5]  }
  0x38   : > { %p273_p5 = scmp.ne.s32.totalorder %s437_s11, %s272_s21  ;;  %s276_s22 = sshll.u32 %s341_s10, 4  ;;  %s277_s22 = int_to_ptr.vmem [resolvable:$false] %s276_s22 }
  0x39   : > { %s278_s23 = scalar_lea.vmem %s277_s22, 256  ;;  %p279_p12 = scmp.lt.s32.totalorder %s437_s11, %s277_s22 }
  0x3a   : > { %p274_p9 = pnand %p273_p5, %p494_p6  ;;  %p280_p2 = scmp.lt.s32.totalorder %s278_s23, %s272_s21 }
  0x3c   : > { %p275_p10 = pneg %p274_p9  ;;  %p281_p3 = por %p280_p2, %p279_p12 }
  0x3e   : > { %p282_p4 = pnand %p281_p3, %p275_p10 }
  0x40   : > { %285 = shalt.err (!%p282_p4)
}
  0x41   : > { %s286_s24 = scalar_lea.hbm %s442_s19, 128  ;;  %s290_s27 = scalar_lea.hbm %s483_s1, 256 }
  0x42   : > { %p287_p7 = scmp.ne.s32.totalorder %s442_s19, %s286_s24  ;;  %p291_p13 = scmp.lt.u32.totalorder %s442_s19, %s483_s1 }
  0x43   : > { %p292_p1 = scmp.lt.u32.totalorder %s290_s27, %s286_s24  ;;  %p294_p5 = scmp.lt.u32.totalorder %s286_s24, %s442_s19 }
  0x44   : > { %p288_p8 = pnand %p287_p7, %p494_p6 }
  0x45   : > { %p293_p0 = por %p292_p1, %p291_p13 }
  0x46   : > { %p289_p11 = pneg %p288_p8 }
  0x47   : > { %p295_p9 = por %p294_p5, %p293_p0 }
  0x49   : > { %p296_p10 = pnand %p295_p9, %p289_p11 }
  0x4b   : > { %299 = shalt.err (!%p296_p10)
}
  0x4c   : > { %198 = dma.vmem_to_hbm [thread:$0]  (%p494_p6), %s437_s11, 128, %s442_s19, %s112_s20  }
  0x4d PF: > { %p210_p12 = scmp.ge.s32.totalorder %s338_s9, 2  ;;  %s137_s30 = sand.u32 1, %s326_s6  }
  0x4e   : > { %p495_p2 = scmp.ne.s32.totalorder %s488_s17, 0  ;;  %s138_s2 = scalar_lea.sflag [#allocation4], %s137_s30 }
  0x50   : > { %p205_p3 = pnand %p210_p12, %p495_p2 }
  0x52   : > { %321 = dma.done.wait (!%p205_p3), %s138_s2, 128  }
  0x53   : > { %323 = vsyncadd (!%p205_p3), %s138_s2, 4294967168  ;;  %p12_p4 = scmp.ge.s32.totalorder %s377_s12, 4   ;;  %s496_s6 = smov %s330_s7 }
  0x54   : > { %s497_s7 = smov %s334_s8  ;;  %s498_s8 = smov %s388_s15 }
  0x55   : > { %s499_s9 = smov %s377_s12  ;;  %14 = sbr.rel (!%p12_p4) target bundleno = 4 (0x4), region = 61 }
  0x5c   :  { %143 = vsyncpa [#allocation3], 1 }
  0x5d   :  { %145 = vsyncpa [#allocation3 + $0x1], 1 }
  0x5e   :  { %146 = vsyncpa [#allocation4], 1 }
  0x5f   :  { %148 = vsyncpa [#allocation4 + $0x1], 1 }

// kernel: tpu_custom_call.1
= control target key start
LH: loop header
LB: loop body
LE: loop exit
PB: predicated region body
PF: predicated region fallthrough
CT: control target
= control target key end

     0   :  { %s3148_s0 = inlined_call_operand.hbm [shape: f32[16,32], index: 0, kind: input, shape index: {}]   ;;  %s3149_s1 = inlined_call_operand.hbm [shape: f32[16,32], index: 1, kind: input, shape index: {}]   ;;  %s3150_s2 = inlined_call_operand.hbm [shape: bf16[32,32], index: 2, kind: input, shape index: {}]   ;;  %s3151_s3 = inlined_call_operand.hbm [shape: f32[1,32], index: 3, kind: input, shape index: {}]   ;;  %s3152_s4 = inlined_call_operand.hbm [shape: bf16[32,64], index: 4, kind: input, shape index: {}]   ;;  %s3153_s5 = inlined_call_operand.hbm [shape: f32[1,64], index: 5, kind: input, shape index: {}]   ;;  %s3154_s6 = inlined_call_operand.hbm [shape: bf16[32,32], index: 6, kind: input, shape index: {}]   ;;  %s3155_s7 = inlined_call_operand.hbm [shape: f32[1,32], index: 7, kind: input, shape index: {}]   ;;  %s3156_s8 = inlined_call_operand.hbm [shape: f32[16,32], index: 8, kind: output, shape index: {}]  }
   0x1   :  { %3163 = sst [smem:[#allocation24_spill]] %s3150_s2 }
   0x2   :  { %3164 = sst [smem:[#allocation25_spill]] %s3151_s3 }
   0x3   :  { %3165 = sst [smem:[#allocation26_spill]] %s3152_s4 }
   0x4   :  { %3166 = sst [smem:[#allocation27_spill]] %s3153_s5 }
   0x5   :  { %3167 = sst [smem:[#allocation28_spill]] %s3154_s6 }
   0x6   :  { %13 = vsyncpa [#allocation3], 0 }
   0x7   :  { %15 = vsyncpa [#allocation3 + $0x1], 0 }
   0x8   :  { %16 = vsyncpa [#allocation6], 0 }
   0x9   :  { %18 = vsyncpa [#allocation6 + $0x1], 0 }
   0xa   :  { %19 = vsyncpa [#allocation9], 0 }
   0xb   :  { %20 = vsyncpa [#allocation12], 0 }
   0xc   :  { %21 = vsyncpa [#allocation15], 0 }
   0xd   :  { %22 = vsyncpa [#allocation4], 0 }
   0xe   :  { %24 = vsyncpa [#allocation4 + $0x1], 0  ;;  %s2586_s27 = smov 0   ;;  %s2588_s28 = smov 0  }
   0xf   :  { %s2590_s29 = smov 0   ;;  %s2592_s30 = smov 0  }
  0x10 LB: > { %s2518_s9 = smov [#allocation7]   ;;  %s2607_s11 = sadd.s32 4294967295, %s2516_s30   ;;  %s2516_s30 = sphi %s2592_s30, %s3199_s30   ;;  %s2512_s29 = sphi %s2590_s29, %s3198_s29   ;;  %s2508_s28 = sphi %s2588_s28, %s3197_s28   ;;  %s2504_s27 = sphi %s2586_s27, %s3196_s27  }
  0x11   : > { %s251_s10 = sshll.u32 %s2518_s9, 4  ;;  %p1911_p0 = scmp.ge.s32.totalorder %s2516_s30, 1  ;;  %s2612_s10 = int_to_ptr.vmem [resolvable:$true] %s251_s10 }
  0x12   : > { %p3159_p1 = scmp.eq.s32.totalorder %s2607_s11, 0  ;;  %p239_p2 = scmp.lt.s32.totalorder %s2516_s30, 3 }
  0x13   : > { %s2519_s13 = smov [#allocation8]   ;;  %s2520_s16 = smov [#allocation11]  }
  0x14   : > { %p2614_p3 = pnand %p1911_p0, %p239_p2  ;;  %s265_s14 = sshll.u32 %s2519_s13, 4  ;;  %s2627_s14 = int_to_ptr.vmem [resolvable:$true] %s265_s14 }
  0x15   : > { %s289_s17 = sshll.u32 %s2520_s16, 4  ;;  %s3170_s2 = sld [smem:[#allocation24_spill]]  ;;  %s2629_s17 = int_to_ptr.vmem [resolvable:$true] %s289_s17 }
  0x16   : > { %s3168_s12 = scalar_select %p2614_p3, 1, 0 }
  0x17   : > { %p2084_p5 = pneg %p2614_p3 }
  0x19   : > { %p2623_p6 = pnand %p2084_p5, %p3159_p1 }
  0x1b   : > { %s2202_s20 = scalar_lea.hbm %s3170_s2, 256  ;;  %p2639_p8 = pneg %p2623_p6 }
  0x1c   : > { %p2203_p7 = scmp.ne.s32.totalorder %s3170_s2, %s2202_s20  ;;  %p2209_p11 = scmp.lt.u32.totalorder %s2202_s20, %s3170_s2 }
  0x1e   : > { %p2205_p9 = pnand %p2639_p8, %p2203_p7 }
  0x20   : > { %p2206_p10 = pneg %p2205_p9 }
  0x22   : > { %p2211_p12 = pnand %p2209_p11, %p2206_p10 }
  0x24   : > { %2214 = shalt.err (!%p2211_p12)
}
  0x25   : > { %s2215_s26 = scalar_lea.vmem %s2612_s10, 256  ;;  %p2223_p5 = scmp.lt.s32.totalorder %s2612_s10, %s2612_s10 }
  0x26   : > { %p2216_p13 = scmp.ne.s32.totalorder %s2612_s10, %s2215_s26  ;;  %p2224_p4 = scmp.lt.s32.totalorder %s2215_s26, %s2215_s26 }
  0x28   : > { %p2218_p0 = pnand %p2216_p13, %p2639_p8  ;;  %p2225_p7 = por %p2224_p4, %p2223_p5 }
  0x2a   : > { %p2219_p2 = pneg %p2218_p0 }
  0x2c   : > { %p2226_p9 = pnand %p2225_p7, %p2219_p2 }
  0x2e   : > { %2229 = shalt.err (!%p2226_p9)
}
  0x2f   : > { %s3157_s9 = smov 64   ;;  %s2522_s13 = smov 4  }
  0x30   : > { %2087 = dma.hbm_to_vmem [thread:$0]  (!%p2623_p6), %s3170_s2, 256, %s2612_s10, [#allocation6], %s3157_s9, %s3157_s9, %s2522_s13  }
  0x31   : > { %s3172_s3 = sld [smem:[#allocation25_spill]] }
  0x37   : > { %s2230_s21 = scalar_lea.hbm %s3172_s3, 16 }
  0x38   : > { %p2231_p4 = scmp.ne.s32.totalorder %s3172_s3, %s2230_s21  ;;  %p2237_p12 = scmp.lt.u32.totalorder %s2230_s21, %s3172_s3 }
  0x3a   : > { %p2233_p10 = pnand %p2231_p4, %p2639_p8 }
  0x3c   : > { %p2234_p11 = pneg %p2233_p10 }
  0x3e   : > { %p2239_p13 = pnand %p2237_p12, %p2234_p11 }
  0x40   : > { %2242 = shalt.err (!%p2239_p13)
}
  0x41   : > { %s2243_s10 = scalar_lea.vmem %s2627_s14, 16  ;;  %s2250_s16 = scalar_lea.vmem %s2627_s14, 32 }
  0x42   : > { %p2244_p0 = scmp.ne.s32.totalorder %s2627_s14, %s2243_s10  ;;  %p2251_p7 = scmp.lt.s32.totalorder %s2627_s14, %s2627_s14 }
  0x43   : > { %p2252_p9 = scmp.lt.s32.totalorder %s2250_s16, %s2243_s10 }
  0x44   : > { %p2246_p2 = pnand %p2244_p0, %p2639_p8 }
  0x45   : > { %p2253_p4 = por %p2252_p9, %p2251_p7 }
  0x46   : > { %p2247_p5 = pneg %p2246_p2 }
  0x48   : > { %p2254_p10 = pnand %p2253_p4, %p2247_p5 }
  0x4a   : > { %2257 = shalt.err (!%p2254_p10)
}
  0x4b   : > { %2090 = dma.hbm_to_vmem [thread:$0]  (!%p2623_p6), %s3172_s3, 16, %s2627_s14, [#allocation9]  }
  0x4c   : > { %s3173_s5 = sld [smem:[#allocation27_spill]] }
  0x52   : > { %s2258_s22 = scalar_lea.hbm %s3173_s5, 16 }
  0x53   : > { %p2259_p11 = scmp.ne.s32.totalorder %s3173_s5, %s2258_s22  ;;  %p2265_p0 = scmp.lt.u32.totalorder %s2258_s22, %s3173_s5 }
  0x55   : > { %p2261_p12 = pnand %p2259_p11, %p2639_p8 }
  0x57   : > { %p2262_p13 = pneg %p2261_p12 }
  0x59   : > { %p2267_p2 = pnand %p2265_p0, %p2262_p13 }
  0x5b   : > { %2270 = shalt.err (!%p2267_p2)
}
  0x5c   : > { %s2271_s14 = scalar_lea.vmem %s2629_s17, 16  ;;  %s2278_s16 = scalar_lea.vmem %s2629_s17, 32 }
  0x5d   : > { %p2272_p5 = scmp.ne.s32.totalorder %s2629_s17, %s2271_s14  ;;  %p2279_p4 = scmp.lt.s32.totalorder %s2629_s17, %s2629_s17 }
  0x5e   : > { %p2280_p10 = scmp.lt.s32.totalorder %s2278_s16, %s2271_s14 }
  0x5f   : > { %p2274_p7 = pnand %p2272_p5, %p2639_p8 }
  0x60   : > { %p2281_p11 = por %p2280_p10, %p2279_p4 }
  0x61   : > { %p2275_p9 = pneg %p2274_p7 }
  0x63   : > { %p2282_p12 = pnand %p2281_p11, %p2275_p9 }
  0x65   : > { %2285 = shalt.err (!%p2282_p12)
}
  0x66   : > { %2096 = dma.hbm_to_vmem [thread:$0]  (!%p2623_p6), %s3173_s5, 16, %s2629_s17, [#allocation12]  }
  0x67   : > { %s2523_s20 = smov [#allocation10]   ;;  %s2524_s22 = smov [#allocation13]  }
  0x68   : > { %s275_s21 = sshll.u32 %s2523_s20, 4  ;;  %s299_s24 = sshll.u32 %s2524_s22, 4  ;;  %s276_s21 = int_to_ptr.vmem [resolvable:$true] %s275_s21  ;;  %s300_s24 = int_to_ptr.vmem [resolvable:$true] %s299_s24 }
  0x69   : > { %s3174_s4 = sld [smem:[#allocation26_spill]] }
  0x6f   : > { %s2286_s10 = scalar_lea.hbm %s3174_s4, 256 }
  0x70   : > { %p2287_p13 = scmp.ne.s32.totalorder %s3174_s4, %s2286_s10  ;;  %p2293_p5 = scmp.lt.u32.totalorder %s2286_s10, %s3174_s4 }
  0x72   : > { %p2289_p0 = pnand %p2287_p13, %p2639_p8 }
  0x74   : > { %p2290_p2 = pneg %p2289_p0 }
  0x76   : > { %p2295_p7 = pnand %p2293_p5, %p2290_p2 }
  0x78   : > { %2298 = shalt.err (!%p2295_p7)
}
  0x79   : > { %s2299_s17 = scalar_lea.vmem %s276_s21, 256  ;;  %p2307_p11 = scmp.lt.s32.totalorder %s276_s21, %s276_s21 }
  0x7a   : > { %p2300_p9 = scmp.ne.s32.totalorder %s276_s21, %s2299_s17  ;;  %p2308_p12 = scmp.lt.s32.totalorder %s2299_s17, %s2299_s17 }
  0x7c   : > { %p2302_p4 = pnand %p2300_p9, %p2639_p8  ;;  %p2309_p1 = por %p2308_p12, %p2307_p11 }
  0x7e   : > { %p2303_p10 = pneg %p2302_p4 }
  0x80   : > { %p2310_p3 = pnand %p2309_p1, %p2303_p10 }
  0x82   : > { %2313 = shalt.err (!%p2310_p3)
}
  0x83   : > { %s3175_s19 = smov 64   ;;  %s3176_s6 = sld [smem:[#allocation28_spill]] }
  0x84   : > { %2093 = dma.hbm_to_vmem [thread:$0]  (!%p2623_p6), %s3174_s4, 256, %s276_s21, [#allocation9], %s3175_s19, %s3175_s19, %s2522_s13  }
  0x89   : > { %s2314_s26 = scalar_lea.hbm %s3176_s6, 256 }
  0x8a   : > { %p2315_p1 = scmp.ne.s32.totalorder %s3176_s6, %s2314_s26  ;;  %p2321_p0 = scmp.lt.u32.totalorder %s2314_s26, %s3176_s6 }
  0x8c   : > { %p2317_p3 = pnand %p2315_p1, %p2639_p8 }
  0x8e   : > { %p2318_p13 = pneg %p2317_p3 }
  0x90   : > { %p2323_p2 = pnand %p2321_p0, %p2318_p13 }
  0x92   : > { %2326 = shalt.err (!%p2323_p2)
}
  0x93   : > { %s2327_s17 = scalar_lea.vmem %s300_s24, 256  ;;  %p2335_p4 = scmp.lt.s32.totalorder %s300_s24, %s300_s24 }
  0x94   : > { %p2328_p5 = scmp.ne.s32.totalorder %s300_s24, %s2327_s17  ;;  %p2336_p10 = scmp.lt.s32.totalorder %s2327_s17, %s2327_s17 }
  0x96   : > { %p2330_p7 = pnand %p2328_p5, %p2639_p8  ;;  %p2337_p11 = por %p2336_p10, %p2335_p4 }
  0x98   : > { %p2331_p9 = pneg %p2330_p7 }
  0x9a   : > { %p2338_p12 = pnand %p2337_p11, %p2331_p9 }
  0x9c   : > { %2341 = shalt.err (!%p2338_p12)
}
  0x9d   : > { %2099 = dma.hbm_to_vmem [thread:$0]  (!%p2623_p6), %s3176_s6, 256, %s300_s24, [#allocation12], %s3175_s19, %s3175_s19, %s2522_s13  }
  0x9e   : > { %s2525_s20 = smov [#allocation14]   ;;  %s2342_s10 = scalar_lea.hbm %s3155_s7, 16 }
  0x9f   : > { %s313_s22 = sshll.u32 %s2525_s20, 4  ;;  %p2343_p1 = scmp.ne.s32.totalorder %s3155_s7, %s2342_s10  ;;  %s314_s22 = int_to_ptr.vmem [resolvable:$true] %s313_s22 }
  0xa0   : > { %p2349_p0 = scmp.lt.u32.totalorder %s2342_s10, %s3155_s7 }
  0xa1   : > { %p2345_p3 = pnand %p2343_p1, %p2639_p8 }
  0xa3   : > { %p2346_p13 = pneg %p2345_p3 }
  0xa5   : > { %p2351_p2 = pnand %p2349_p0, %p2346_p13 }
  0xa7   : > { %2354 = shalt.err (!%p2351_p2)
}
  0xa8   : > { %s2355_s13 = scalar_lea.vmem %s314_s22, 16  ;;  %s2362_s24 = scalar_lea.vmem %s314_s22, 32 }
  0xa9   : > { %p2356_p5 = scmp.ne.s32.totalorder %s314_s22, %s2355_s13  ;;  %p2363_p4 = scmp.lt.s32.totalorder %s314_s22, %s314_s22 }
  0xaa   : > { %p2364_p10 = scmp.lt.s32.totalorder %s2362_s24, %s2355_s13 }
  0xab   : > { %p2358_p7 = pnand %p2356_p5, %p2639_p8 }
  0xac   : > { %p2365_p11 = por %p2364_p10, %p2363_p4 }
  0xad   : > { %p2359_p9 = pneg %p2358_p7 }
  0xaf   : > { %p2366_p12 = pnand %p2365_p11, %p2359_p9 }
  0xb1   : > { %2369 = shalt.err (!%p2366_p12)
}
  0xb2   : > { %2102 = dma.hbm_to_vmem [thread:$0]  (!%p2623_p6), %s3155_s7, 16, %s314_s22, [#allocation15]  }
  0xb3   : > { %s1910_s23 = sadd.s32 4294967294, %s2516_s30   ;;  %s2773_s15 = sadd.s32 1, %s2516_s30  }
  0xb4   : > { %s34_s9 = ssub.s32 %s2516_s30, %s2773_s15  ;;  %s37_s20 = sadd.s32 1, %s2512_s29 }
  0xb5   : > { %p35_p8 = scmp.eq.s32.totalorder %s34_s9, 0  ;;  %p44_p1 = scmp.ne.s32.totalorder %s2512_s29, %s2508_s28 }
  0xb6   : > { %p45_p3 = scmp.eq.s32.totalorder %s2516_s30, 0  ;;  %p50_p13 = scmp.ne.s32.totalorder %s2508_s28, %s2504_s27 }
  0xb7   : > { %s2784_s25 = scalar_select %p35_p8, %s2512_s29, %s37_s20  }
  0xb8   : > { %p2786_p0 = por %p45_p3, %p44_p1  ;;  %p3178_p2 = scmp.eq.s32.totalorder %s2607_s11, 0 }
  0xb9   : > { %p226_p5 = scmp.eq.s32.totalorder %s2607_s11, 1  ;;  %p232_p7 = scmp.eq.s32.totalorder %s1910_s23, 1 }
  0xba   : > { %p2792_p6 = por %p3178_p2, %p50_p13  ;;  %p2120_p9 = scmp.lt.s32.totalorder %s2516_s30, 2 }
  0xbb   : > { %s324_s10 = sand.u32 1, %s2512_s29   ;;  %p2799_p4 = por %p226_p5, %p44_p1 }
  0xbc   : > { %s3179_s22 = scalar_select %p2792_p6, 1, 0 }
  0xbd   : > { %s3180_s14 = scalar_select %p2799_p4, 1, 0 }
  0xbe   : > { %p2803_p10 = por %p232_p7, %p50_p13  ;;  %s2807_s18 = sshll.u32 %s324_s10, 3 }
  0xbf   : > { %s1920_s17 = sshll.u32 %s2516_s30, 7  ;;  %s328_s21 = scalar_lea.vmem [#allocation2], %s2807_s18 }
  0xc0   : > { %s3181_s16 = scalar_select %p2803_p10, 1, 0 }
  0xc1   : > { %s2813_s19 = scalar_lea.hbm %s3148_s0, %s1920_s17  ;;  %s335_s23 = sshll.u32 %s328_s21, 4  ;;  %s2816_s23 = int_to_ptr.vmem [resolvable:$true] %s335_s23 }
  0xc2   : > { %p2820_p11 = pnand %p2120_p9, %p2786_p0  ;;  %s2827_s13 = scalar_lea.hbm %s3149_s1, %s1920_s17 }
  0xc3   : > { %s342_s24 = sand.u32 1, %s2516_s30   ;;  %s325_s3 = scalar_lea.sflag [#allocation3], %s324_s10 }
  0xc4   : > { %s2370_s4 = scalar_lea.hbm %s2813_s19, 128  ;;  %p2372_p8 = pneg %p2820_p11 }
  0xc5   : > { %p2371_p12 = scmp.ne.s32.totalorder %s2813_s19, %s2370_s4  ;;  %s2375_s5 = scalar_lea.hbm %s3148_s0, 256 }
  0xc6   : > { %p2376_p13 = scmp.lt.u32.totalorder %s2813_s19, %s3148_s0  ;;  %p2377_p0 = scmp.lt.u32.totalorder %s2375_s5, %s2370_s4 }
  0xc7   : > { %p2373_p1 = pnand %p2372_p8, %p2371_p12  ;;  %p2379_p5 = scmp.lt.u32.totalorder %s2370_s4, %s2813_s19 }
  0xc8   : > { %p2378_p2 = por %p2377_p0, %p2376_p13 }
  0xc9   : > { %p2374_p3 = pneg %p2373_p1 }
  0xca   : > { %p2380_p7 = por %p2379_p5, %p2378_p2 }
  0xcc   : > { %p2381_p9 = pnand %p2380_p7, %p2374_p3 }
  0xce   : > { %2384 = shalt.err (!%p2381_p9)
}
  0xcf   : > { %s2385_s10 = scalar_lea.vmem %s2816_s23, 128  ;;  %s2526_s17 = smov [#allocation2]  }
  0xd0   : > { %p2386_p12 = scmp.ne.s32.totalorder %s2816_s23, %s2385_s10  ;;  %s2390_s20 = sshll.u32 %s2526_s17, 4  ;;  %s2391_s20 = int_to_ptr.vmem [resolvable:$false] %s2390_s20 }
  0xd1   : > { %s2392_s6 = scalar_lea.vmem %s2391_s20, 256  ;;  %p2393_p4 = scmp.lt.s32.totalorder %s2816_s23, %s2391_s20 }
  0xd2   : > { %p2388_p1 = pnand %p2386_p12, %p2372_p8  ;;  %p2394_p13 = scmp.lt.s32.totalorder %s2392_s6, %s2385_s10 }
  0xd4   : > { %p2389_p10 = pneg %p2388_p1  ;;  %p2395_p0 = por %p2394_p13, %p2393_p4 }
  0xd6   : > { %p2396_p2 = pnand %p2395_p0, %p2389_p10 }
  0xd8   : > { %2399 = shalt.err (!%p2396_p2)
}
  0xd9   : > { %2106 = dma.hbm_to_vmem [thread:$0]  (!%p2820_p11), %s2813_s19, 128, %s2816_s23, %s325_s3  }
  0xda   : > { %s346_s4 = scalar_lea.vmem [#allocation5], %s2807_s18  ;;  %s343_s26 = scalar_lea.sflag [#allocation6], %s342_s24 }
  0xdb   : > { %s353_s5 = sshll.u32 %s346_s4, 4  ;;  %s2400_s21 = scalar_lea.hbm %s2827_s13, 128  ;;  %s354_s5 = int_to_ptr.vmem [resolvable:$true] %s353_s5 }
  0xdc   : > { %p2401_p4 = scmp.ne.s32.totalorder %s2827_s13, %s2400_s21  ;;  %s2405_s17 = scalar_lea.hbm %s3149_s1, 256 }
  0xdd   : > { %p2406_p5 = scmp.lt.u32.totalorder %s2827_s13, %s3149_s1  ;;  %p2407_p7 = scmp.lt.u32.totalorder %s2405_s17, %s2400_s21 }
  0xde   : > { %p2403_p10 = pnand %p2401_p4, %p2372_p8  ;;  %p2409_p12 = scmp.lt.u32.totalorder %s2400_s21, %s2827_s13 }
  0xdf   : > { %p2408_p9 = por %p2407_p7, %p2406_p5 }
  0xe0   : > { %p2404_p3 = pneg %p2403_p10 }
  0xe1   : > { %p2410_p1 = por %p2409_p12, %p2408_p9 }
  0xe3   : > { %p2411_p13 = pnand %p2410_p1, %p2404_p3 }
  0xe5   : > { %2414 = shalt.err (!%p2411_p13)
}
  0xe6   : > { %s2415_s3 = scalar_lea.vmem %s354_s5, 128  ;;  %s2527_s18 = smov [#allocation5]  }
  0xe7   : > { %p2416_p0 = scmp.ne.s32.totalorder %s354_s5, %s2415_s3  ;;  %s2420_s19 = sshll.u32 %s2527_s18, 4  ;;  %s2421_s19 = int_to_ptr.vmem [resolvable:$false] %s2420_s19 }
  0xe8   : > { %s2422_s23 = scalar_lea.vmem %s2421_s19, 256  ;;  %p2423_p10 = scmp.lt.s32.totalorder %s354_s5, %s2421_s19 }
  0xe9   : > { %p2418_p2 = pnand %p2416_p0, %p2372_p8  ;;  %p2424_p6 = scmp.lt.s32.totalorder %s2422_s23, %s2415_s3 }
  0xeb   : > { %p2419_p4 = pneg %p2418_p2  ;;  %p2425_p5 = por %p2424_p6, %p2423_p10 }
  0xed   : > { %p2426_p7 = pnand %p2425_p5, %p2419_p4 }
  0xef   : > { %2429 = shalt.err (!%p2426_p7)
}
  0xf0   : > { %2109 = dma.hbm_to_vmem [thread:$0]  (!%p2820_p11), %s2827_s13, 128, %s354_s5, %s343_s26  }
  0xf1   : > { %p3183_p3 = scmp.ne.s32.totalorder %s3168_s12, 0 }
  0xf2   : > { %s2880_s24 = sand.u32 (!%p3183_p3), 1, %s2508_s28   ;;  %p3184_p6 = scmp.ne.s32.totalorder (!%p3183_p3), %s3179_s22, 0 }
  0xf3   : > { %362 = sbr.rel (%p3183_p3) target bundleno = 1817 (0x719), region = 52  ;;  %s2883_s4 = sshll.u32 (!%p3183_p3), %s2880_s24, 3 }
  0xf4   : > { %s365_s21 = scalar_lea.sflag (!%p3183_p3), [#allocation3], %s2880_s24  ;;  %s368_s2 = scalar_lea.vmem (!%p3183_p3), [#allocation2], %s2883_s4 }
  0xfa   : > { %2475 = dma.done.wait (%p3184_p6), %s365_s21, 128  }
  0xfb   : > { %2477 = vsyncadd (%p3184_p6), %s365_s21, 4294967168  ;;  %s373_s12 = sand.u32 1, %s2607_s11   ;;  %s377_s13 = scalar_lea.vmem [#allocation5], %s2883_s4 }
  0xfc   : > { %s374_s9 = scalar_lea.sflag [#allocation6], %s373_s12 }
  0xfd   : > { %2479 = dma.done.wait (%p3184_p6), %s374_s9, 128  }
  0xfe   : > { %2481 = vsyncadd (%p3184_p6), %s374_s9, 4294967168  ;;  %p3185_p11 = scmp.eq.s32.totalorder %s2607_s11, 0 }
 0x100   : > { %2483 = dma.done.wait (%p3185_p11), [#allocation6], 256   ;;  %p3186_p8 = pmov %p3185_p11 }
 0x102   : > { %2485 = vsyncadd (%p3186_p8), [#allocation6], 4294967040  ;;  %p3187_p9 = pmov %p3186_p8 }
 0x103   : > { %p3188_p12 = pmov %p3186_p8 }
 0x104   : > { %2487 = dma.done.wait (%p3187_p9), [#allocation9], 272  }
 0x105   : > { %2489 = vsyncadd (%p3188_p12), [#allocation9], 4294967024  ;;  %p3189_p1 = pmov %p3186_p8 }
 0x107   : > { %2491 = dma.done.wait (%p3189_p1), [#allocation12], 272   ;;  %p3190_p13 = pmov %p3189_p1 }
 0x108   : > { %p3191_p0 = pmov %p3189_p1 }
 0x109   : > { %2493 = vsyncadd (%p3190_p13), [#allocation12], 4294967024 }
 0x10a   : > { %2495 = dma.done.wait (%p3191_p0), [#allocation15], 16   ;;  %p3192_p2 = pmov %p3191_p0 }
 0x10b   : > { %v2528_v0 = vmov 0.0   ;;  %vm2529_vm0 = vmmov 0   ;;  %v2180_v1 = vld [vmem:[#allocation10] sm:$0xff]   ;;  %v2181_v2 = vld [vmem:[#allocation7] sm:$0xff]   ;;  %v2183_v5 = vld [vmem:[#allocation7 + $0x8] sm:$0xff]   ;;  %vm465_vm1 = vcmask 261120   ;;  %v588_v25 = vlaneseq }
 0x10c   : > { %2497 = vsyncadd (%p3192_p2), [#allocation15], 4294967280  ;;  %1990 = vmatprep.subr.bf16.mxu1 %v2528_v0  ;;  %1982 = vmatprep.subr.bf16.mxu0 %v2528_v0  ;;  %v2182_v3 = vld [vmem:[#allocation10 + $0x8] sm:$0xff]   ;;  %v1937_v9 = vld [vmem:[#allocation11] ss:$0 sm:$0xff]  ;;  %s2530_s22 = smov 104  }
 0x10d   : > { %1994 = vmatprep.mubr.msk.bf16.mxu1 %vm2529_vm0, %v2528_v0  ;;  %1986 = vmatprep.mubr.msk.bf16.mxu0 %vm2529_vm0, %v2528_v0  ;;  %v509_v4 = vld [vmem:[%s377_s13] sm:$0xff]  ;;  %v440_v6 = vld [vmem:[%s368_s2] sm:$0xff]  ;;  %s2531_s5 = smov 120   ;;  %s2532_s26 = smov 112   ;;  %v2533_v23 = vmov 1983009808  }
 0x10e   : > { %1991 = vmatpush3.bf16.msra.mxu1 %v2180_v1  ;;  %1983 = vmatpush3.bf16.msra.mxu0 %v2181_v2  ;;  %v510_v7 = vpack.c.bf16 %v509_v4, %v509_v4  ;;  %v441_v8 = vpack.c.bf16 %v440_v6, %v440_v6  ;;  %v1933_v10 = vld [vmem:[#allocation8] ss:$0 sm:$0xff]  ;;  %v586_v24 = vunpack.c.l.s4 %v2533_v23  ;;  %v2534_v26 = vmov 1934713408   ;;  %s2536_s10 = smov 96   ;;  %s2537_s17 = smov 8  }
 0x10f   : > { %1992 = vmatprep.subr.bf16.mxu1 %v2528_v0  ;;  %1984 = vmatprep.subr.bf16.mxu0 %v2528_v0  ;;  %v603_v27 = vunpack.c.l.s4 %v2534_v26  ;;  %v589_v29 = vshrl.u32 %v588_v25, 7  ;;  %v2535_v45 = vmov 0   ;;  %vm1085_vm2 = vcmask 64512   ;;  %s2538_s20 = smov 16   ;;  %s2539_s6 = smov 24  }
 0x110   : > { %v587_v28 = vunpack.c.0.s8 %v586_v24  ;;  %vm1321_vm3 = vcmask 1043456   ;;  %vm1674_vm4 = vcmask 130048   ;;  %vm1677_vm5 = vcmask 195584   ;;  %s1954_s3 = sshll.u32 %s2607_s11, 7  ;;  %s438_s18 = scalar_lea.vmem [#allocation16], %s2883_s4 }
 0x111   : > { %v604_v30 = vunpack.c.0.s8 %v603_v27  ;;  %s1760_s19 = sshll.u32 %s438_s18, 4  ;;  %s3103_s2 = scalar_lea.hbm %s3156_s8, %s1954_s3  ;;  %s3105_s19 = int_to_ptr.vmem [resolvable:$true] %s1760_s19 }
 0x112   : > { %1993 = vmatpush3.bf16.msra.mxu1 %v2182_v3  ;;  %1985 = vmatpush3.bf16.msra.mxu0 %v2183_v5  ;;  %v2936_v31 = vsub.s32 %v587_v28, %v589_v29  ;;  %s1747_s11 = scalar_lea.sflag [#allocation4], %s2880_s24  ;;  %s2430_s4 = scalar_lea.vmem %s3105_s19, 128 }
 0x113   : > { %2004 = vmatprep.subr.bf16.mxu1 %v2528_v0  ;;  %1998 = vmatprep.subr.bf16.mxu0 %v2528_v0  ;;  %v2944_v35 = vsub.s32 %v604_v30, %v589_v29  ;;  %p2431_p4 = scmp.ne.s32.totalorder %s3105_s19, %s2430_s4  ;;  %p3193_p10 = scmp.ne.s32.totalorder %s3180_s14, 0 }
 0x114   : > { %s2540_s12 = smov [#allocation16]  }
 0x115   : > { %1995 = vmatmul.mubr.msk.bf16.vlgmr.msra.gmra.mrb[0].mxu1 %vm465_vm1, %v510_v7  ;;  %1987 = vmatmul.mubr.msk.bf16.vlgmr.msra.gmra.mrb[0].mxu0 %vm465_vm1, %v441_v8  ;;  %p2432_p5 = pnand %p2431_p4, %p3193_p10  ;;  %s2434_s9 = sshll.u32 %s2540_s12, 4  ;;  %s2435_s9 = int_to_ptr.vmem [resolvable:$false] %s2434_s9 }
 0x116   : > { %2006 = vmatprep.mubr.msk.bf16.mxu1 %vm2529_vm0, %v2528_v0  ;;  %2000 = vmatprep.mubr.msk.bf16.mxu0 %vm2529_vm0, %v2528_v0  ;;  %s2436_s13 = scalar_lea.vmem %s2435_s9, 256  ;;  %p2437_p3 = scmp.lt.s32.totalorder %s3105_s19, %s2435_s9 }
 0x117   : > { %p2433_p7 = pneg %p2432_p5  ;;  %p2438_p6 = scmp.lt.s32.totalorder %s2436_s13, %s2430_s4 }
 0x119   : > { %p2439_p11 = por %p2438_p6, %p2437_p3 }
 0x11b   : > { %p2440_p8 = pnand %p2439_p11, %p2433_p7 }
 0x1e8   : > { %v571_v11 = vpop.f32.mrb[0].mxu1  ;;  %v503_v14 = vpop.f32.mrb[0].mxu0 }
 0x1e9   : > { %v572_v12 = vadd.f32 %v1937_v9, %v571_v11  ;;  %v1996_v13 = vpop.f32.mrb[1].mxu1  ;;  %v504_v16 = vadd.f32 %v1933_v10, %v503_v14  ;;  %v1988_v17 = vpop.f32.mrb[1].mxu0 }
 0x1ea   : > { %v574_v15 = vpop.f32.mrb[2].mxu1  ;;  %v506_v20 = vpop.f32.mrb[2].mxu0 }
 0x1eb   : > { %v2931_v18 = vpack.c.bf16 %v572_v12, %v572_v12  ;;  %v1997_v19 = vpop.f32.mrb[3].mxu1  ;;  %v1989_v21 = vpop.f32.mrb[3].mxu0  ;;  %v577_v22 = vpack.c.bf16 %v504_v16, %v504_v16 }
 0x1ed   : > { %752 = vrot.lane.b32.xlu1 %v2931_v18, %s2530_s22  ;;  %748 = vrot.lane.b32.xlu0 %v2931_v18, %s2531_s5  ;;  %v760_v44 = vrot.slane %v2931_v18, %v2936_v31  ;;  %v591_v52 = vrot.slane %v577_v22, %v2936_v31 }
 0x1f1   : > { %750 = vrot.lane.b32.xlu0 %v2931_v18, %s2532_s26  ;;  %579 = vrot.lane.b32.xlu1 %v577_v22, %s2531_s5 }
 0x1f5   : > { %581 = vrot.lane.b32.xlu0 %v577_v22, %s2532_s26  ;;  %583 = vrot.lane.b32.xlu1 %v577_v22, %s2530_s22 }
 0x25f   : > { %v2938_v32 = vpop.permute.xlu1 %752  ;;  %v2940_v33 = vpop.permute.xlu0 %748 }
 0x260   : > { %v802_v34 = vrot.slane %v2938_v32, %v2936_v31  ;;  %v794_v36 = vrot.slane %v2940_v33, %v2936_v31 }
 0x262   : > { %v803_v37 = vcombine.low %v794_v36, %v802_v34  ;;  %v804_v38 = vcombine.high %v794_v36, %v802_v34 }
 0x263   : > { %v2948_v39 = vpop.permute.xlu0 %750  ;;  %v580_v40 = vpop.permute.xlu1 %579 }
 0x264   : > { %v811_v41 = vrot.slane %v803_v37, %v2944_v35  ;;  %v818_v42 = vrot.slane %v804_v38, %v2944_v35  ;;  %v768_v43 = vrot.slane %v2948_v39, %v2936_v31  ;;  %v625_v48 = vrot.slane %v580_v40, %v2936_v31 }
 0x266   : > { %v819_v46 = vcombine.high %v811_v41, %v2535_v45  ;;  %v820_v47 = vcombine.high %v818_v42, %v2535_v45  ;;  %v769_v49 = vcombine.low %v760_v44, %v768_v43  ;;  %v770_v50 = vcombine.high %v760_v44, %v768_v43 }
 0x267   : > { %v582_v51 = vpop.permute.xlu0 %581  ;;  %v584_v53 = vpop.permute.xlu1 %583  ;;  %v826_v54 = vshrl.u32 %v811_v41, 16  ;;  %v842_v55 = vshrl.u32 %v818_v42, 16 }
 0x268   : > { %v599_v56 = vrot.slane %v582_v51, %v2936_v31  ;;  %v633_v57 = vrot.slane %v584_v53, %v2936_v31  ;;  %v834_v58 = vshrl.u32 %v819_v46, 16  ;;  %v850_v59 = vshrl.u32 %v820_v47, 16 }
 0x269   : > { %v777_v60 = vrot.slane %v769_v49, %v2944_v35  ;;  %v784_v61 = vrot.slane %v770_v50, %v2944_v35 }
 0x26a   : > { %v600_v62 = vcombine.low %v591_v52, %v599_v56  ;;  %v601_v63 = vcombine.high %v591_v52, %v599_v56  ;;  %v634_v1 = vcombine.low %v625_v48, %v633_v57  ;;  %v635_v2 = vcombine.high %v625_v48, %v633_v57 }
 0x26b   : > { %v785_v3 = vcombine.high %v777_v60, %v2535_v45  ;;  %v786_v4 = vcombine.high %v784_v61, %v2535_v45  ;;  %v823_v5 = vpack.i.b16 %v811_v41, %v777_v60  ;;  %v825_v6 = vshrl.u32 %v777_v60, 16 }
 0x26c   : > { %v839_v7 = vpack.i.b16 %v818_v42, %v784_v61  ;;  %v841_v8 = vshrl.u32 %v784_v61, 16  ;;  %v608_v9 = vrot.slane %v600_v62, %v2944_v35  ;;  %v615_v10 = vrot.slane %v601_v63, %v2944_v35 }
 0x26d   : > { %v827_v11 = vpack.i.b16 %v826_v54, %v825_v6  ;;  %v831_v12 = vpack.i.b16 %v819_v46, %v785_v3  ;;  %v833_v13 = vshrl.u32 %v785_v3, 16  ;;  %v847_v14 = vpack.i.b16 %v820_v47, %v786_v4 }
 0x26e   : > { %v843_v15 = vpack.i.b16 %v842_v55, %v841_v8  ;;  %v849_v16 = vshrl.u32 %v786_v4, 16  ;;  %v853_v17 = vcombine.low %v823_v5, %v839_v7  ;;  %v616_v19 = vcombine.high %v608_v9, %v2535_v45 }
 0x26f   : > { %v835_v20 = vpack.i.b16 %v834_v58, %v833_v13  ;;  %v861_v21 = vcombine.low %v831_v12, %v847_v14  ;;  %v617_v22 = vcombine.high %v615_v10, %v2535_v45  ;;  %v656_v25 = vshrl.u32 %v608_v9, 16 }
 0x270   : > { %v851_v23 = vpack.i.b16 %v850_v59, %v849_v16  ;;  %v878_v24 = vcombine.low %v827_v11, %v843_v15  ;;  %v664_v26 = vshrl.u32 %v616_v19, 16  ;;  %v672_v27 = vshrl.u32 %v615_v10, 16 }
 0x271   : > { %v680_v28 = vshrl.u32 %v617_v22, 16  ;;  %v642_v29 = vrot.slane %v634_v1, %v2944_v35  ;;  %v649_v30 = vrot.slane %v635_v2, %v2944_v35  ;;  %v860_v34 = vrot.slane %v853_v17, %v2936_v31 }
 0x272   : > { %v868_v36 = vrot.slane %v861_v21, %v2936_v31  ;;  %v885_v37 = vrot.slane %v878_v24, %v2936_v31  ;;  %v886_v38 = vcombine.low %v835_v20, %v851_v23 }
 0x273   : > { %v650_v40 = vcombine.high %v642_v29, %v2535_v45  ;;  %v651_v41 = vcombine.high %v649_v30, %v2535_v45  ;;  %v654_v42 = vpack.i.b16 %v642_v29, %v608_v9  ;;  %v657_v43 = vshrl.u32 %v642_v29, 16 }
 0x274   : > { %v670_v44 = vpack.i.b16 %v649_v30, %v615_v10  ;;  %v673_v46 = vshrl.u32 %v649_v30, 16  ;;  %v869_v47 = vcombine.low %v860_v34, %v868_v36  ;;  %v893_v48 = vrot.slane %v886_v38, %v2936_v31 }
 0x275   : > { %v658_v49 = vpack.i.b16 %v657_v43, %v656_v25  ;;  %v662_v50 = vpack.i.b16 %v650_v40, %v616_v19  ;;  %v665_v51 = vshrl.u32 %v650_v40, 16  ;;  %v678_v52 = vpack.i.b16 %v651_v41, %v617_v22 }
 0x276   : > { %v674_v53 = vpack.i.b16 %v673_v46, %v672_v27  ;;  %v681_v54 = vshrl.u32 %v651_v41, 16  ;;  %v684_v55 = vcombine.low %v654_v42, %v670_v44  ;;  %v876_v56 = vrot.slane %v869_v47, %v2944_v35 }
 0x277   : > { %v666_v57 = vpack.i.b16 %v665_v51, %v664_v26  ;;  %v692_v58 = vcombine.low %v662_v50, %v678_v52  ;;  %v894_v59 = vcombine.low %v885_v37, %v893_v48 }
 0x278   : > { %v682_v60 = vpack.i.b16 %v681_v54, %v680_v28  ;;  %v709_v61 = vcombine.low %v658_v49, %v674_v53  ;;  %v691_v62 = vrot.slane %v684_v55, %v2936_v31  ;;  %v906_v3 = vshrl.u32 %v876_v56, 16 }
 0x279   : > { %v699_v63 = vrot.slane %v692_v58, %v2936_v31  ;;  %v901_v1 = vrot.slane %v894_v59, %v2944_v35  ;;  %v877_v12 = vcombine.high %v876_v56, %v2535_v45 }
 0x27a   : > { %v717_v2 = vcombine.low %v666_v57, %v682_v60  ;;  %v716_v8 = vrot.slane %v709_v61, %v2936_v31 }
 0x27b   : > { %v700_v4 = vcombine.low %v691_v62, %v699_v63  ;;  %v905_v5 = vpack.i.b16 %v901_v1, %v876_v56  ;;  %v907_v6 = vshrl.u32 %v901_v1, 16  ;;  %v902_v7 = vcombine.high %v901_v1, %v2535_v45 }
 0x27c   : > { %v724_v9 = vrot.slane %v717_v2, %v2936_v31  ;;  %v912_v20 = vshrl.u32 %v877_v12, 16 }
 0x27d   : > { %v1090_v10 = vsel %vm1085_vm2, %v905_v5, 0  ;;  %v908_v11 = vpack.i.b16 %v907_v6, %v906_v3  ;;  %v707_v15 = vrot.slane %v700_v4, %v2944_v35  ;;  %v913_v16 = vshrl.u32 %v902_v7, 16 }
 0x27e   : > { %v725_v13 = vcombine.low %v716_v8, %v724_v9  ;;  %1999 = vmatpush3.bf16.xpose.msra.mxu0 %v1090_v10  ;;  %v911_v19 = vpack.i.b16 %v902_v7, %v877_v12 }
 0x27f   : > { %v1136_v14 = vsel %vm1085_vm2, %v908_v11, 0  ;;  %2010 = vmatprep.subr.bf16.mxu0 %v2528_v0  ;;  %v737_v23 = vshrl.u32 %v707_v15, 16  ;;  %v914_v24 = vpack.i.b16 %v913_v16, %v912_v20  ;;  %v708_v29 = vcombine.high %v707_v15, %v2535_v45 }
 0x280   : > { %2005 = vmatpush3.bf16.xpose.msra.mxu1 %v1136_v14  ;;  %v732_v17 = vrot.slane %v725_v13, %v2944_v35  ;;  %v1182_v25 = vsel %vm1085_vm2, %v911_v19, 0 }
 0x281   : > { %2016 = vmatprep.subr.bf16.mxu1 %v2528_v0  ;;  %v1228_v28 = vsel %vm1085_vm2, %v914_v24, 0  ;;  %v743_v36 = vshrl.u32 %v708_v29, 16 }
 0x282   : > { %v738_v21 = vshrl.u32 %v732_v17, 16  ;;  %v736_v22 = vpack.i.b16 %v732_v17, %v707_v15  ;;  %v733_v27 = vcombine.high %v732_v17, %v2535_v45 }
 0x284   : > { %v739_v26 = vpack.i.b16 %v738_v21, %v737_v23  ;;  %v744_v30 = vshrl.u32 %v733_v27, 16  ;;  %v742_v34 = vpack.i.b16 %v733_v27, %v708_v29 }
 0x285   : > { %2001 = vmatmul.mubr.msk.bf16.vlgmr.msra.gmra.mrb[4].mxu0 %vm1085_vm2, %v736_v22 }
 0x286   : > { %2011 = vmatpush3.bf16.xpose.msra.mxu0 %v1182_v25  ;;  %2012 = vmatprep.mubr.msk.bf16.mxu0 %vm2529_vm0, %v2528_v0  ;;  %v745_v37 = vpack.i.b16 %v744_v30, %v743_v36 }
 0x287   : > { %2007 = vmatmul.mubr.msk.bf16.vlgmr.msra.gmra.mrb[4].mxu1 %vm1085_vm2, %v739_v26  ;;  %2022 = vmatprep.subr.bf16.mxu0 %v2528_v0 }
 0x288   : > { %2017 = vmatpush3.bf16.xpose.msra.mxu1 %v1228_v28  ;;  %2018 = vmatprep.mubr.msk.bf16.mxu1 %vm2529_vm0, %v2528_v0 }
 0x289   : > { %2028 = vmatprep.subr.bf16.mxu1 %v2528_v0 }
 0x28d   : > { %2013 = vmatmul.mubr.msk.bf16.vlgmr.msra.gmra.mrb[8].mxu0 %vm1085_vm2, %v742_v34 }
 0x28e   : > { %2024 = vmatprep.mubr.msk.bf16.mxu0 %vm2529_vm0, %v2528_v0 }
 0x28f   : > { %2019 = vmatmul.mubr.msk.bf16.vlgmr.msra.gmra.mrb[8].mxu1 %vm1085_vm2, %v745_v37 }
 0x290   : > { %2030 = vmatprep.mubr.msk.bf16.mxu1 %vm2529_vm0, %v2528_v0 }
 0x358   : > { %v1126_v38 = vpop.f32.mrb[4].mxu0 }
 0x359   : > { %v2002_v40 = vpop.f32.mrb[5].mxu0  ;;  %v1270_v41 = vsel %vm1085_vm2, %v1126_v38, -inf }
 0x35a   : > { %v1172_v42 = vpop.f32.mrb[4].mxu1  ;;  %1271 = vmax.xlane.f32.xlu0 %v1270_v41  ;;  %v1129_v43 = vpop.f32.mrb[6].mxu0 }
 0x35b   : > { %v2003_v44 = vpop.f32.mrb[7].mxu0  ;;  %v2008_v46 = vpop.f32.mrb[5].mxu1  ;;  %v1273_v47 = vsel %vm1085_vm2, %v1172_v42, -inf }
 0x35c   : > { %1274 = vmax.xlane.f32.xlu1 %v1273_v47  ;;  %v1175_v48 = vpop.f32.mrb[6].mxu1 }
 0x35d   : > { %v2009_v49 = vpop.f32.mrb[7].mxu1 }
 0x360   : > { %v1218_v50 = vpop.f32.mrb[8].mxu0 }
 0x361   : > { %v2014_v51 = vpop.f32.mrb[9].mxu0  ;;  %v1276_v52 = vsel %vm1085_vm2, %v1218_v50, -inf }
 0x362   : > { %v1264_v53 = vpop.f32.mrb[8].mxu1  ;;  %1277 = vmax.xlane.f32.xlu0 %v1276_v52  ;;  %v1221_v54 = vpop.f32.mrb[10].mxu0 }
 0x363   : > { %v2015_v55 = vpop.f32.mrb[11].mxu0  ;;  %v2020_v56 = vpop.f32.mrb[9].mxu1  ;;  %v1279_v59 = vsel %vm1085_vm2, %v1264_v53, -inf }
 0x364   : > { %v1267_v57 = vpop.f32.mrb[10].mxu1 }
 0x365   : > { %v2021_v58 = vpop.f32.mrb[11].mxu1 }
 0x366   : > { %1280 = vmax.xlane.f32.xlu0 %v1279_v59 }
 0x36d   : > { %915 = vrot.lane.b32.xlu1 %v2931_v18, %s2536_s10 }
 0x3e7   : > { %v1272_v60 = vpop.xlane.xlu0 %1271 }
 0x3e8   : > { %v1282_v61 = vsub.f32 %v1126_v38, %v1272_v60 }
 0x3e9   : > { %v1275_v62 = vpop.xlane.xlu1 %1274 }
 0x3ea   : > { %v1286_v63 = vmul.f32 1.442695, %v1282_v61  ;;  %v1283_v1 = vsub.f32 %v1172_v42, %v1275_v62 }
 0x3ec   : > { %2186 = vpow2.f32 %v1286_v63  ;;  %v1288_v2 = vmul.f32 1.442695, %v1283_v1 }
 0x3ee   : > { %2188 = vpow2.f32 %v1288_v2 }
 0x3ef   : > { %v1278_v18 = vpop.xlane.xlu0 %1277 }
 0x3f0   : > { %v1284_v8 = vsub.f32 %v1218_v50, %v1278_v18 }
 0x3f2   : > { %v1290_v10 = vmul.f32 1.442695, %v1284_v8 }
 0x3f3   : > { %v1281_v7 = vpop.xlane.xlu0 %1280 }
 0x3f4   : > { %v1285_v9 = vsub.f32 %v1264_v53, %v1281_v7  ;;  %2190 = vpow2.f32 %v1290_v10 }
 0x3f6   : > { %v3015_v3 = vpop.eup %2186  ;;  %v1292_v11 = vmul.f32 1.442695, %v1285_v9 }
 0x3f7   : > { %v1294_v4 = vsel %vm1085_vm2, %v3015_v3, 0.0 }
 0x3f8   : > { %v3019_v5 = vpop.eup %2188  ;;  %1295 = vadd.xlane.f32.xlu1 %v1294_v4  ;;  %2192 = vpow2.f32 %v1292_v11 }
 0x3f9   : > { %v1297_v6 = vsel %vm1085_vm2, %v3019_v5, 0.0 }
 0x3fa   : > { %1298 = vadd.xlane.f32.xlu0 %v1297_v6 }
 0x3fe   : > { %v3026_v12 = vpop.eup %2190 }
 0x3ff   : > { %v1300_v14 = vsel %vm1085_vm2, %v3026_v12, 0.0 }
 0x402   : > { %v3028_v13 = vpop.eup %2192 }
 0x409   : > { %919 = vrot.lane.b32.xlu1 %v2948_v39, %s2536_s10 }
 0x40d   : > { %921 = vrot.lane.b32.xlu1 %v2938_v32, %s2536_s10  ;;  %v1303_v32 = vsel %vm1085_vm2, %v3028_v13, 0.0 }
 0x410   : > { %917 = vrot.lane.b32.xlu0 %v2940_v33, %s2536_s10  ;;  %v916_v33 = vpop.permute.xlu1 %915 }
 0x411   : > { %v930_v17 = vrot.slane %v916_v33, %v2936_v31 }
 0x42f   : > { %1301 = vadd.xlane.f32.xlu0 %v1300_v14 }
 0x431   : > { %1304 = vadd.xlane.f32.xlu1 %v1303_v32 }
 0x485   : > { %v1296_v39 = vpop.xlane.xlu1 %1295 }
 0x486   : > { %2194 = vrcp.f32 %v1296_v39 }
 0x487   : > { %v1299_v15 = vpop.xlane.xlu0 %1298 }
 0x488   : > { %2196 = vrcp.f32 %v1299_v15 }
 0x489   : > { %v920_v16 = vpop.permute.xlu1 %919 }
 0x48a   : > { %v938_v19 = vrot.slane %v920_v16, %v2936_v31 }
 0x48b   : > { %v918_v22 = vpop.permute.xlu0 %917 }
 0x48c   : > { %v939_v20 = vcombine.low %v930_v17, %v938_v19  ;;  %v940_v21 = vcombine.high %v930_v17, %v938_v19  ;;  %v964_v26 = vrot.slane %v918_v22, %v2936_v31 }
 0x48d   : > { %v922_v23 = vpop.permute.xlu1 %921 }
 0x48e   : > { %v947_v24 = vrot.slane %v939_v20, %v2944_v35  ;;  %v972_v25 = vrot.slane %v922_v23, %v2936_v31  ;;  %v954_v27 = vrot.slane %v940_v21, %v2944_v35 }
 0x490   : > { %v973_v28 = vcombine.low %v964_v26, %v972_v25  ;;  %v974_v29 = vcombine.high %v964_v26, %v972_v25  ;;  %v955_v30 = vcombine.high %v947_v24, %v2535_v45  ;;  %v956_v37 = vcombine.high %v954_v27, %v2535_v45  ;;  %v2195_v1 = vpop.eup %2194 }
 0x491   : > { %v995_v38 = vshrl.u32 %v947_v24, 16  ;;  %v1011_v46 = vshrl.u32 %v954_v27, 16  ;;  %v1310_v11 = vmul.f32 %v2195_v1, %v3015_v3 }
 0x492   : > { %v981_v34 = vrot.slane %v973_v28, %v2944_v35  ;;  %v988_v36 = vrot.slane %v974_v29, %v2944_v35  ;;  %v1003_v44 = vshrl.u32 %v955_v30, 16  ;;  %v1019_v53 = vshrl.u32 %v956_v37, 16  ;;  %v2197_v4 = vpop.eup %2196 }
 0x493   : > { %v1311_v15 = vmul.f32 %v2197_v4, %v3019_v5  ;;  %v1314_v23 = vpack.c.bf16 %v1310_v11, %v1310_v11 }
 0x494   : > { %v989_v40 = vcombine.high %v981_v34, %v2535_v45  ;;  %v990_v41 = vcombine.high %v988_v36, %v2535_v45  ;;  %v993_v42 = vpack.i.b16 %v981_v34, %v947_v24  ;;  %v996_v43 = vshrl.u32 %v981_v34, 16 }
 0x495   : > { %v1009_v47 = vpack.i.b16 %v988_v36, %v954_v27  ;;  %v1012_v48 = vshrl.u32 %v988_v36, 16  ;;  %v1315_v25 = vpack.c.bf16 %v1311_v15, %v1311_v15 }
 0x496   : > { %v997_v49 = vpack.i.b16 %v996_v43, %v995_v38  ;;  %v1001_v50 = vpack.i.b16 %v989_v40, %v955_v30  ;;  %v1004_v51 = vshrl.u32 %v989_v40, 16  ;;  %v1017_v52 = vpack.i.b16 %v990_v41, %v956_v37  ;;  %v2184_v38 = vld [vmem:[#allocation13] sm:$0xff]  }
 0x497   : > { %v1013_v54 = vpack.i.b16 %v1012_v48, %v1011_v46  ;;  %v1020_v55 = vshrl.u32 %v990_v41, 16  ;;  %v1023_v56 = vcombine.low %v993_v42, %v1009_v47 }
 0x498   : > { %v1005_v57 = vpack.i.b16 %v1004_v51, %v1003_v44  ;;  %v1031_v58 = vcombine.low %v1001_v50, %v1017_v52 }
 0x499   : > { %v1021_v59 = vpack.i.b16 %v1020_v55, %v1019_v53  ;;  %v1048_v60 = vcombine.low %v997_v49, %v1013_v54  ;;  %v1030_v61 = vrot.slane %v1023_v56, %v2936_v31 }
 0x49a   : > { %v1038_v62 = vrot.slane %v1031_v58, %v2936_v31 }
 0x49b   : > { %v1056_v63 = vcombine.low %v1005_v57, %v1021_v59  ;;  %v1055_v6 = vrot.slane %v1048_v60, %v2936_v31 }
 0x49c   : > { %v1039_v2 = vcombine.low %v1030_v61, %v1038_v62 }
 0x49d   : > { %v1063_v18 = vrot.slane %v1056_v63, %v2936_v31 }
 0x49e   : > { %v1046_v7 = vrot.slane %v1039_v2, %v2944_v35 }
 0x49f   : > { %v1064_v8 = vcombine.low %v1055_v6, %v1063_v18 }
 0x4a0   : > { %v1047_v9 = vcombine.high %v1046_v7, %v2535_v45  ;;  %v1076_v32 = vshrl.u32 %v1046_v7, 16 }
 0x4a1   : > { %v1071_v10 = vrot.slane %v1064_v8, %v2944_v35 }
 0x4a2   : > { %v1082_v16 = vshrl.u32 %v1047_v9, 16 }
 0x4a3   : > { %v1075_v14 = vpack.i.b16 %v1071_v10, %v1046_v7  ;;  %v1077_v33 = vshrl.u32 %v1071_v10, 16  ;;  %v1072_v39 = vcombine.high %v1071_v10, %v2535_v45 }
 0x4a5   : > { %v1323_v17 = vsel %vm1321_vm3, %v1075_v14, 0  ;;  %v1078_v19 = vpack.i.b16 %v1077_v33, %v1076_v32  ;;  %v1081_v20 = vpack.i.b16 %v1072_v39, %v1047_v9  ;;  %v1083_v21 = vshrl.u32 %v1072_v39, 16 }
 0x4a6   : > { %2023 = vmatpush3.bf16.msra.mxu0 %v1323_v17 }
 0x4a7   : > { %v1369_v22 = vsel %vm1321_vm3, %v1078_v19, 0  ;;  %2034 = vmatprep.subr.bf16.mxu0 %v2528_v0  ;;  %v1084_v3 = vpack.i.b16 %v1083_v21, %v1082_v16  ;;  %v1415_v24 = vsel %vm1321_vm3, %v1081_v20, 0 }
 0x4a8   : > { %2029 = vmatpush3.bf16.msra.mxu1 %v1369_v22 }
 0x4a9   : > { %2025 = vmatmul.mubr.msk.bf16.vlgmr.msra.gmra.mrb[12].mxu0 %vm1085_vm2, %v1314_v23  ;;  %2040 = vmatprep.subr.bf16.mxu1 %v2528_v0  ;;  %v1461_v5 = vsel %vm1321_vm3, %v1084_v3, 0 }
 0x4aa   : > { %2035 = vmatpush3.bf16.msra.mxu0 %v1415_v24  ;;  %2036 = vmatprep.mubr.msk.bf16.mxu0 %vm2529_vm0, %v2528_v0 }
 0x4ab   : > { %2031 = vmatmul.mubr.msk.bf16.vlgmr.msra.gmra.mrb[12].mxu1 %vm1085_vm2, %v1315_v25  ;;  %2046 = vmatprep.subr.bf16.mxu0 %v2528_v0 }
 0x4ac   : > { %2041 = vmatpush3.bf16.msra.mxu1 %v1461_v5  ;;  %2042 = vmatprep.mubr.msk.bf16.mxu1 %vm2529_vm0, %v2528_v0 }
 0x4bc   : > { %v1302_v26 = vpop.xlane.xlu0 %1301 }
 0x4bd   : > { %2198 = vrcp.f32 %v1302_v26 }
 0x4be   : > { %v1305_v27 = vpop.xlane.xlu1 %1304 }
 0x4bf   : > { %2200 = vrcp.f32 %v1305_v27 }
 0x4c7   : > { %v2199_v28 = vpop.eup %2198 }
 0x4c8   : > { %v1312_v29 = vmul.f32 %v2199_v28, %v3026_v12 }
 0x4c9   : > { %v2201_v30 = vpop.eup %2200 }
 0x4ca   : > { %v1313_v34 = vmul.f32 %v2201_v30, %v3028_v13  ;;  %v1316_v36 = vpack.c.bf16 %v1312_v29, %v1312_v29 }
 0x4cc   : > { %2037 = vmatmul.mubr.msk.bf16.vlgmr.msra.gmra.mrb[16].mxu0 %vm1085_vm2, %v1316_v36  ;;  %v1317_v37 = vpack.c.bf16 %v1313_v34, %v1313_v34  ;;  %v2185_v36 = vld [vmem:[#allocation13 + $0x8] sm:$0xff]  }
 0x4cd   : > { %2050 = vmatprep.mubr.msk.bf16.mxu0 %vm2529_vm0, %v2528_v0  ;;  %2047 = vmatpush3.bf16.msra.mxu0 %v2184_v38 }
 0x4ce   : > { %2043 = vmatmul.mubr.msk.bf16.vlgmr.msra.gmra.mrb[16].mxu1 %vm1085_vm2, %v1317_v37  ;;  %2048 = vmatprep.subr.bf16.mxu0 %v2528_v0 }
 0x4d1   : > { %2049 = vmatpush3.bf16.msra.mxu0 %v2185_v36 }
 0x57c   : > { %v1359_v40 = vpop.f32.mrb[12].mxu0 }
 0x57d   : > { %v2026_v41 = vpop.f32.mrb[13].mxu0  ;;  %v1503_v47 = vpack.c.bf16 %v1359_v40, %v1359_v40 }
 0x57e   : > { %v1362_v42 = vpop.f32.mrb[14].mxu0  ;;  %v1405_v12 = vpop.f32.mrb[12].mxu1 }
 0x57f   : > { %v2027_v43 = vpop.f32.mrb[15].mxu0  ;;  %v2032_v44 = vpop.f32.mrb[13].mxu1  ;;  %v1537_v49 = vpack.c.bf16 %v1405_v12, %v1405_v12  ;;  %v1510_v54 = vrot.slane %v1503_v47, %v2936_v31 }
 0x580   : > { %v1408_v13 = vpop.f32.mrb[14].mxu1 }
 0x581   : > { %v2033_v46 = vpop.f32.mrb[15].mxu1  ;;  %v1544_v59 = vrot.slane %v1537_v49, %v2936_v31 }
 0x59f   : > { %v1451_v48 = vpop.f32.mrb[16].mxu0 }
 0x5a0   : > { %v1511_v50 = vpack.c.bf16 %v1451_v48, %v1451_v48  ;;  %v2038_v51 = vpop.f32.mrb[17].mxu0 }
 0x5a1   : > { %v1454_v52 = vpop.f32.mrb[18].mxu0  ;;  %v1497_v53 = vpop.f32.mrb[16].mxu1 }
 0x5a2   : > { %v1518_v55 = vrot.slane %v1511_v50, %v2936_v31  ;;  %v1545_v0 = vpack.c.bf16 %v1497_v53, %v1497_v53  ;;  %v2039_v56 = vpop.f32.mrb[19].mxu0  ;;  %v2044_v57 = vpop.f32.mrb[17].mxu1 }
 0x5a3   : > { %v1500_v58 = vpop.f32.mrb[18].mxu1 }
 0x5a4   : > { %v1519_v60 = vcombine.low %v1510_v54, %v1518_v55  ;;  %v1520_v61 = vcombine.high %v1510_v54, %v1518_v55  ;;  %v1552_v62 = vrot.slane %v1545_v0, %v2936_v31  ;;  %v2045_v63 = vpop.f32.mrb[19].mxu1  ;;  %v1949_v0 = vld [vmem:[#allocation14] ss:$0 sm:$0xff] }
 0x5a6   : > { %v1527_v1 = vrot.slane %v1519_v60, %v2944_v35  ;;  %v1534_v2 = vrot.slane %v1520_v61, %v2944_v35  ;;  %v1553_v4 = vcombine.low %v1544_v59, %v1552_v62  ;;  %v1554_v6 = vcombine.high %v1544_v59, %v1552_v62 }
 0x5a8   : > { %v1535_v18 = vcombine.high %v1527_v1, %v2535_v45  ;;  %v1561_v7 = vrot.slane %v1553_v4, %v2944_v35  ;;  %v1568_v8 = vrot.slane %v1554_v6, %v2944_v35  ;;  %v1536_v9 = vcombine.high %v1534_v2, %v2535_v45 }
 0x5a9   : > { %v1575_v10 = vshrl.u32 %v1527_v1, 16  ;;  %v1591_v15 = vshrl.u32 %v1534_v2, 16 }
 0x5aa   : > { %v1569_v11 = vcombine.high %v1561_v7, %v2535_v45  ;;  %v1570_v14 = vcombine.high %v1568_v8, %v2535_v45  ;;  %v1573_v32 = vpack.i.b16 %v1561_v7, %v1527_v1  ;;  %v1576_v33 = vshrl.u32 %v1561_v7, 16 }
 0x5ab   : > { %v1583_v39 = vshrl.u32 %v1535_v18, 16  ;;  %v1589_v16 = vpack.i.b16 %v1568_v8, %v1534_v2  ;;  %v1592_v17 = vshrl.u32 %v1568_v8, 16  ;;  %v1599_v23 = vshrl.u32 %v1536_v9, 16 }
 0x5ac   : > { %v1577_v19 = vpack.i.b16 %v1576_v33, %v1575_v10  ;;  %v1581_v20 = vpack.i.b16 %v1569_v11, %v1535_v18  ;;  %v1584_v21 = vshrl.u32 %v1569_v11, 16  ;;  %v1597_v22 = vpack.i.b16 %v1570_v14, %v1536_v9 }
 0x5ad   : > { %v1593_v3 = vpack.i.b16 %v1592_v17, %v1591_v15  ;;  %v1600_v24 = vshrl.u32 %v1570_v14, 16  ;;  %v1603_v25 = vcombine.low %v1573_v32, %v1589_v16 }
 0x5ae   : > { %v1585_v5 = vpack.i.b16 %v1584_v21, %v1583_v39  ;;  %v1611_v26 = vcombine.low %v1581_v20, %v1597_v22 }
 0x5af   : > { %v1601_v27 = vpack.i.b16 %v1600_v24, %v1599_v23  ;;  %v1628_v28 = vcombine.low %v1577_v19, %v1593_v3  ;;  %v1610_v29 = vrot.slane %v1603_v25, %v2936_v31 }
 0x5b0   : > { %v1618_v30 = vrot.slane %v1611_v26, %v2936_v31 }
 0x5b1   : > { %v1636_v34 = vcombine.low %v1585_v5, %v1601_v27  ;;  %v1635_v38 = vrot.slane %v1628_v28, %v2936_v31 }
 0x5b2   : > { %v1619_v37 = vcombine.low %v1610_v29, %v1618_v30 }
 0x5b3   : > { %v1643_v40 = vrot.slane %v1636_v34, %v2936_v31 }
 0x5b4   : > { %v1626_v41 = vrot.slane %v1619_v37, %v2944_v35 }
 0x5b5   : > { %v1644_v42 = vcombine.low %v1635_v38, %v1643_v40 }
 0x5b6   : > { %v1627_v43 = vcombine.high %v1626_v41, %v2535_v45  ;;  %v1656_v44 = vshrl.u32 %v1626_v41, 16 }
 0x5b7   : > { %v1651_v12 = vrot.slane %v1644_v42, %v2944_v35 }
 0x5b8   : > { %v1662_v50 = vshrl.u32 %v1627_v43, 16 }
 0x5b9   : > { %v1657_v13 = vshrl.u32 %v1651_v12, 16  ;;  %v1652_v46 = vcombine.high %v1651_v12, %v2535_v45  ;;  %v1655_v47 = vpack.i.b16 %v1651_v12, %v1626_v41 }
 0x5bb   : > { %v1658_v48 = vpack.i.b16 %v1657_v13, %v1656_v44  ;;  %v1661_v49 = vpack.i.b16 %v1652_v46, %v1627_v43  ;;  %v1663_v51 = vshrl.u32 %v1652_v46, 16 }
 0x5bd   : > { %1665 = vrot.lane.b32.xlu0 %v1658_v48, %s2537_s17  ;;  %1667 = vrot.lane.b32.xlu1 %v1661_v49, %s2538_s20  ;;  %v1664_v31 = vpack.i.b16 %v1663_v51, %v1662_v50 }
 0x5c1   : > { %1669 = vrot.lane.b32.xlu0 %v1664_v31, %s2539_s6 }
 0x62f   : > { %v1666_v35 = vpop.permute.xlu0 %1665  ;;  %v1668_v53 = vpop.permute.xlu1 %1667 }
 0x630   : > { %v1673_v52 = vsel %vm1085_vm2, %v1655_v47, %v1666_v35 }
 0x631   : > { %v1676_v45 = vsel %vm1674_vm4, %v1673_v52, %v1668_v53 }
 0x633   : > { %v1670_v54 = vpop.permute.xlu0 %1669 }
 0x634   : > { %v1679_v55 = vsel %vm1677_vm5, %v1676_v45, %v1670_v54 }
 0x635   : > { %2051 = vmatmul.mubr.msk.bf16.vlgmr.msra.gmra.mrb[20].mxu0 %vm465_vm1, %v1679_v55 }
 0x708   : > { %v1739_v56 = vpop.f32.mrb[20].mxu0 }
 0x709   : > { %v1740_v57 = vadd.f32 %v1949_v0, %v1739_v56  ;;  %v2052_v58 = vpop.f32.mrb[21].mxu0 }
 0x70a   : > { %v1742_v59 = vpop.f32.mrb[22].mxu0 }
 0x70b   : > { %v2053_v60 = vpop.f32.mrb[23].mxu0  ;;  %1745 = vst.msk [vmem:[%s438_s18] sm:$0xff] %vm465_vm1, %v1740_v57 }
 0x70c   : > { %2443 = shalt.err (!%p2440_p8)
}
 0x70d   : > { %s2444_s24 = scalar_lea.hbm %s3103_s2, 128  ;;  %s2448_s26 = scalar_lea.hbm %s3156_s8, 256 }
 0x70e   : > { %p2445_p9 = scmp.ne.s32.totalorder %s3103_s2, %s2444_s24  ;;  %p2449_p13 = scmp.lt.u32.totalorder %s3103_s2, %s3156_s8 }
 0x70f   : > { %p2450_p0 = scmp.lt.u32.totalorder %s2448_s26, %s2444_s24  ;;  %p2452_p4 = scmp.lt.u32.totalorder %s2444_s24, %s3103_s2 }
 0x710   : > { %p2446_p12 = pnand %p2445_p9, %p3193_p10 }
 0x711   : > { %p2451_p2 = por %p2450_p0, %p2449_p13 }
 0x712   : > { %p2447_p1 = pneg %p2446_p12 }
 0x713   : > { %p2453_p5 = por %p2452_p4, %p2451_p2 }
 0x715   : > { %p2454_p7 = pnand %p2453_p5, %p2447_p1 }
 0x717   : > { %2457 = shalt.err (!%p2454_p7)
}
 0x718   : > { %2082 = dma.vmem_to_hbm [thread:$0]  (%p3193_p10), %s3105_s19, 128, %s3103_s2, %s1747_s11  }
 0x719 PF: > { %s1772_s20 = sand.u32 1, %s2504_s27   ;;  %p3194_p3 = scmp.ne.s32.totalorder %s3181_s16, 0 }
 0x71a   : > { %p3195_p6 = scmp.ge.s32.totalorder %s2516_s30, 2  ;;  %s1773_s6 = scalar_lea.sflag [#allocation4], %s1772_s20 }
 0x71c   : > { %p2111_p11 = pnand %p3195_p6, %p3194_p3 }
 0x71e   : > { %2499 = dma.done.wait (!%p2111_p11), %s1773_s6, 128  }
 0x71f   : > { %2501 = vsyncadd (!%p2111_p11), %s1773_s6, 4294967168  ;;  %p27_p8 = scmp.ge.s32.totalorder %s2773_s15, 4   ;;  %s3196_s27 = smov %s2508_s28 }
 0x720   : > { %s3197_s28 = smov %s2512_s29  ;;  %s3198_s29 = smov %s2784_s25 }
 0x721   : > { %s3199_s30 = smov %s2773_s15  ;;  %29 = sbr.rel (!%p27_p8) target bundleno = 16 (0x10), region = 134 }
 0x728   :  { %1778 = vsyncpa [#allocation3], 1 }
 0x729   :  { %1780 = vsyncpa [#allocation3 + $0x1], 1 }
 0x72a   :  { %1781 = vsyncpa [#allocation6], 1 }
 0x72b   :  { %1783 = vsyncpa [#allocation6 + $0x1], 1 }
 0x72c   :  { %1784 = vsyncpa [#allocation9], 1 }
 0x72d   :  { %1785 = vsyncpa [#allocation12], 1 }
 0x72e   :  { %1786 = vsyncpa [#allocation15], 1 }
 0x72f   :  { %1787 = vsyncpa [#allocation4], 1 }
 0x730   :  { %1789 = vsyncpa [#allocation4 + $0x1], 1 }

</bundles_post_ra>
